<compile_context>
chip_gen: v7x
topology: tpu7x:2x2x1
jax: 0.10.0
libtpu: 0.0.40
codegen_flags: <defaults>
</compile_context>

<pallas_src>
import functools
import math

import jax
import jax.numpy as jnp
from jax.experimental import pallas as pl
from jax.experimental.pallas import tpu as pltpu

# ----------------------------- tiny ViT config ------------------------------
IMG = 16          # spatial size
PATCH = 8         # patch size (kernel == stride)
CIN = 3           # input channels
HIDDEN = 32       # hidden size D
HEADS = 2
HEAD_DIM = HIDDEN // HEADS
MLP = 64          # intermediate size
LAYERS = 2
EPS = 1e-12       # HF ViT layer_norm_eps
GRID_P = IMG // PATCH
NPATCH = GRID_P * GRID_P      # 4 patches
SEQ = NPATCH + 1              # +1 for CLS
CPP = CIN * PATCH * PATCH     # flattened patch length


# --------------------------- shared math helpers ----------------------------
def _layernorm(x, gamma, beta):
    mu = jnp.mean(x, axis=-1, keepdims=True)
    var = jnp.mean(jnp.square(x - mu), axis=-1, keepdims=True)
    return (x - mu) * jax.lax.rsqrt(var + EPS) * gamma + beta


def _gelu(x):
    # TODO(synk): HF ViT default act is exact (erf) GELU; tanh approximation is
    # used for guaranteed Pallas/Mosaic lowering (reference uses same formula).
    c = math.sqrt(2.0 / math.pi)
    return 0.5 * x * (1.0 + jnp.tanh(c * (x + 0.044715 * x * x * x)))


# ------------------------------- fused kernel --------------------------------
def _vit_kernel(
    bpg,                          # static: images per grid step
    x_ref,                        # (bpg, NPATCH, CPP)   bf16 unfolded pixels
    pw_ref,                       # (CPP, H)             bf16 patch-embed weight
    emb_ref,                      # (SEQ, H)  f32: row0 = cls+pos0, rows1.. = pos[1:]+patch_b
    lnm_ref,                      # (L, 6, H) f32: [ln1_g, ln1_b, ln2_g, ln2_b, bo, b2]
    wqkv_ref,                     # (L, H, 3H) bf16
    bqkv_ref,                     # (L, 1, 3H) f32
    wo_ref,                       # (L, H, H)  bf16
    w1_ref,                       # (L, H, MLP) bf16
    b1_ref,                       # (L, 1, MLP) f32
    w2_ref,                       # (L, MLP, H) bf16
    lnf_ref,                      # (2, H) f32 final LayerNorm [gamma; beta]
    o_ref,                        # (bpg, NPATCH, H) f32  (CLS already dropped)
):
    f32 = jnp.float32
    bf16 = jnp.bfloat16
    scale = 1.0 / math.sqrt(HEAD_DIM)

    # ---- patch embedding (bias/cls/pos folded into emb_ref) ----
    xin = jnp.concatenate([x_ref[b] for b in range(bpg)], axis=0)   # (bpg*NPATCH, CPP)
    tok = jnp.dot(xin, pw_ref[...], preferred_element_type=f32)      # (bpg*NPATCH, H)

    # build [CLS || patches] per image in registers (no VMEM scratch roundtrip)
    rows = []
    for b in range(bpg):
        rows.append(emb_ref[0:1, :])                                  # cls + pos[0]
        rows.append(tok[b * NPATCH:(b + 1) * NPATCH, :] + emb_ref[1:SEQ, :])
    h = jnp.concatenate(rows, axis=0)                                 # (bpg*SEQ, H) f32

    for l in range(LAYERS):                                           # static unroll
        # ---------------- self-attention (pre-LN) ----------------
        n1 = _layernorm(h, lnm_ref[l, 0:1, :], lnm_ref[l, 1:2, :])
        qkv = (jnp.dot(n1.astype(bf16), wqkv_ref[l],
                       preferred_element_type=f32) + bqkv_ref[l])     # (bpg*SEQ, 3H)

        ctx_rows = []
        for b in range(bpg):                                          # static unroll
            r = b * SEQ
            qkv_b = qkv[r:r + SEQ, :]
            heads = []
            for hh in range(HEADS):                                   # static unroll
                c = hh * HEAD_DIM
                qh = qkv_b[:, c:c + HEAD_DIM]
                kh = qkv_b[:, HIDDEN + c:HIDDEN + c + HEAD_DIM]
                vh = qkv_b[:, 2 * HIDDEN + c:2 * HIDDEN + c + HEAD_DIM]
                # tiny activation-activation matmuls kept f32 for softmax fidelity
                s = jax.lax.dot_general(
                    qh, kh, dimension_numbers=(((1,), (1,)), ((), ())),
                    preferred_element_type=f32) * scale               # (SEQ, SEQ)
                s = s - jnp.max(s, axis=-1, keepdims=True)
                e = jnp.exp(s)
                p = e * pl.reciprocal(jnp.sum(e, axis=-1, keepdims=True), approx=True)
                heads.append(jnp.dot(p, vh, preferred_element_type=f32))   # (SEQ, hd)
            ctx_rows.append(jnp.concatenate(heads, axis=-1))          # (SEQ, H)
        ctx = jnp.concatenate(ctx_rows, axis=0)                       # (bpg*SEQ, H)

        h = h + (jnp.dot(ctx.astype(bf16), wo_ref[l],
                         preferred_element_type=f32) + lnm_ref[l, 4:5, :])

        # ---------------- MLP (pre-LN) ----------------
        n2 = _layernorm(h, lnm_ref[l, 2:3, :], lnm_ref[l, 3:4, :])
        ff = (jnp.dot(n2.astype(bf16), w1_ref[l],
                      preferred_element_type=f32) + b1_ref[l])
        ff = _gelu(ff)
        ff = (jnp.dot(ff.astype(bf16), w2_ref[l],
                      preferred_element_type=f32) + lnm_ref[l, 5:6, :])
        h = h + ff

    # ---- final LayerNorm, drop CLS row in-kernel ----
    hn = _layernorm(h, lnf_ref[0:1, :], lnf_ref[1:2, :])              # (bpg*SEQ, H)
    for b in range(bpg):
        o_ref[b] = hn[b * SEQ + 1:(b + 1) * SEQ, :].astype(o_ref.dtype)


# ------------------------------- glue (JAX) ----------------------------------
def extract_patches(x):
    # x: (B, C, H, W) NCHW -> (B, NPATCH, C*P*P) with per-patch order (c, ph, pw)
    B, C, H, W = x.shape
    p = x.reshape(B, C, GRID_P, PATCH, GRID_P, PATCH)
    p = p.transpose(0, 2, 4, 1, 3, 5)                 # (B, gh, gw, C, ph, pw)
    return p.reshape(B, NPATCH, CPP)


def pack_params(params):
    """One-time weight packing (call at model-load time, NOT per forward)."""
    L = params["layers"]
    bf16 = jnp.bfloat16
    pos = params["pos"].reshape(SEQ, HIDDEN)
    emb = jnp.concatenate(
        [params["cls"].reshape(1, HIDDEN) + pos[0:1],
         pos[1:] + params["patch_b"]], axis=0)                        # (SEQ, H)
    return dict(
        patch_w=params["patch_w"].astype(bf16),                       # (CPP, H)
        emb=emb.astype(jnp.float32),                                  # (SEQ, H)
        ln_misc=jnp.stack([jnp.concatenate(
            [lp["ln1_g"], lp["ln1_b"], lp["ln2_g"], lp["ln2_b"],
             lp["bo"], lp["b2"]], axis=0) for lp in L]),              # (L, 6, H)
        wqkv=jnp.stack([jnp.concatenate([lp["wq"], lp["wk"], lp["wv"]], axis=1)
                        for lp in L]).astype(bf16),                   # (L, H, 3H)
        bqkv=jnp.stack([jnp.concatenate([lp["bq"], lp["bk"], lp["bv"]], axis=1)
                        for lp in L]),                                # (L, 1, 3H)
        wo=jnp.stack([lp["wo"] for lp in L]).astype(bf16),            # (L, H, H)
        w1=jnp.stack([lp["w1"] for lp in L]).astype(bf16),            # (L, H, MLP)
        b1=jnp.stack([lp["b1"] for lp in L]),                         # (L, 1, MLP)
        w2=jnp.stack([lp["w2"] for lp in L]).astype(bf16),            # (L, MLP, H)
        ln_f=jnp.concatenate([params["ln_g"], params["ln_b"]], axis=0),  # (2, H)
    )


def forward(x, pk):
    B = x.shape[0]
    patches = extract_patches(x).astype(jnp.bfloat16)                 # (B, NPATCH, CPP)

    # 2-wide parallel grid when possible (one step per v7x TensorCore);
    # single step otherwise (v5e/v6e have one TC -> avoid per-step overhead).
    gsteps = 2 if (B >= 2 and B % 2 == 0) else 1
    bpg = B // gsteps

    weights = [pk["patch_w"], pk["emb"], pk["ln_misc"], pk["wqkv"], pk["bqkv"],
               pk["wo"], pk["w1"], pk["b1"], pk["w2"], pk["ln_f"]]

    in_specs = [pl.BlockSpec((bpg, NPATCH, CPP), lambda g: (g, 0, 0))]
    for w in weights:   # full block, constant index map -> resident across steps
        in_specs.append(pl.BlockSpec(w.shape, lambda g, nd=w.ndim: (0,) * nd))

    flops = B * (2 * NPATCH * CPP * HIDDEN
                 + LAYERS * (2 * SEQ * HIDDEN * 3 * HIDDEN
                             + HEADS * 4 * SEQ * SEQ * HEAD_DIM
                             + 2 * SEQ * HIDDEN * HIDDEN
                             + 4 * SEQ * HIDDEN * MLP))
    transcendentals = B * (LAYERS * (HEADS * SEQ * SEQ + SEQ * MLP) + 5 * SEQ)
    bytes_accessed = (int(patches.size) * 2 + B * NPATCH * HIDDEN * 4
                      + sum(int(w.size) * int(w.dtype.itemsize) for w in weights))

    out = pl.pallas_call(
        functools.partial(_vit_kernel, bpg),
        out_shape=jax.ShapeDtypeStruct((B, NPATCH, HIDDEN), jnp.float32),
        grid=(gsteps,),
        in_specs=in_specs,
        out_specs=pl.BlockSpec((bpg, NPATCH, HIDDEN), lambda g: (g, 0, 0)),
        compiler_params=pltpu.CompilerParams(dimension_semantics=("parallel",)),
        cost_estimate=pl.CostEstimate(flops=int(flops),
                                      transcendentals=int(transcendentals),
                                      bytes_accessed=int(bytes_accessed)),
    )(patches, *weights)
    return out                                   # CLS already dropped in-kernel


# ----------------------------- pure-JAX reference ----------------------------
def forward_ref(x, params):
    B = x.shape[0]
    patches = extract_patches(x).reshape(B * NPATCH, CPP)
    tok = (patches @ params["patch_w"] + params["patch_b"]).reshape(B, NPATCH, HIDDEN)
    cls = jnp.broadcast_to(params["cls"], (B, 1, HIDDEN))
    h = jnp.concatenate([cls, tok], axis=1) + params["pos"]
    for lp in params["layers"]:
        n1 = _layernorm(h, lp["ln1_g"], lp["ln1_b"])
        q = n1 @ lp["wq"] + lp["bq"]
        k = n1 @ lp["wk"] + lp["bk"]
        v = n1 @ lp["wv"] + lp["bv"]
        qh = q.reshape(B, SEQ, HEADS, HEAD_DIM).transpose(0, 2, 1, 3)
        kh = k.reshape(B, SEQ, HEADS, HEAD_DIM).transpose(0, 2, 1, 3)
        vh = v.reshape(B, SEQ, HEADS, HEAD_DIM).transpose(0, 2, 1, 3)
        s = jnp.einsum("bhqd,bhkd->bhqk", qh, kh) / math.sqrt(HEAD_DIM)
        p = jax.nn.softmax(s, axis=-1)
        ctx = jnp.einsum("bhqk,bhkd->bhqd", p, vh)
        ctx = ctx.transpose(0, 2, 1, 3).reshape(B, SEQ, HIDDEN)
        h = h + ctx @ lp["wo"] + lp["bo"]
        n2 = _layernorm(h, lp["ln2_g"], lp["ln2_b"])
        h = h + _gelu(n2 @ lp["w1"] + lp["b1"]) @ lp["w2"] + lp["b2"]
    h = _layernorm(h, params["ln_g"], params["ln_b"])
    return h[:, 1:, :]


# ------------------------------- param init ----------------------------------
def make_params(key):
    def nrm(k, shape):
        return 0.02 * jax.random.normal(k, shape, jnp.float32)

    keys = iter(jax.random.split(key, 8 + LAYERS * 8))
    params = {
        "patch_w": nrm(next(keys), (CPP, HIDDEN)),
        "patch_b": jnp.zeros((1, HIDDEN), jnp.float32),
        "cls": nrm(next(keys), (1, 1, HIDDEN)),
        "pos": nrm(next(keys), (1, SEQ, HIDDEN)),
        "ln_g": jnp.ones((1, HIDDEN), jnp.float32),
        "ln_b": jnp.zeros((1, HIDDEN), jnp.float32),
        "layers": [],
    }
    for _ in range(LAYERS):
        lp = {
            "ln1_g": jnp.ones((1, HIDDEN), jnp.float32),
            "ln1_b": jnp.zeros((1, HIDDEN), jnp.float32),
            "wq": nrm(next(keys), (HIDDEN, HIDDEN)),
            "bq": jnp.zeros((1, HIDDEN), jnp.float32),
            "wk": nrm(next(keys), (HIDDEN, HIDDEN)),
            "bk": jnp.zeros((1, HIDDEN), jnp.float32),
            "wv": nrm(next(keys), (HIDDEN, HIDDEN)),
            "bv": jnp.zeros((1, HIDDEN), jnp.float32),
            "wo": nrm(next(keys), (HIDDEN, HIDDEN)),
            "bo": jnp.zeros((1, HIDDEN), jnp.float32),
            "ln2_g": jnp.ones((1, HIDDEN), jnp.float32),
            "ln2_b": jnp.zeros((1, HIDDEN), jnp.float32),
            "w1": nrm(next(keys), (HIDDEN, MLP)),
            "b1": jnp.zeros((1, MLP), jnp.float32),
            "w2": nrm(next(keys), (MLP, HIDDEN)),
            "b2": jnp.zeros((1, HIDDEN), jnp.float32),
        }
        params["layers"].append(lp)
    return params


# ----------------------------------- main -------------------------------------
if __name__ == "__main__":
    key = jax.random.PRNGKey(0)
    kx, kp = jax.random.split(key)
    x = jax.random.normal(kx, (2, CIN, IMG, IMG), jnp.float32)   # NCHW pixels
    params = make_params(kp)
    packed = pack_params(params)      # one-time weight packing, hoisted out of forward

    fwd = jax.jit(forward)
    out = jax.block_until_ready(fwd(x, packed))                  # (2, 4, 32)
    ref = jax.block_until_ready(forward_ref(x, params))

    assert out.shape == (2, NPATCH, HIDDEN), out.shape
    assert bool(jnp.all(jnp.isfinite(out)))
    # Kernel uses bf16 MXU operands (f32 accumulation) vs. the pure-f32 reference,
    # plus the EUP approximate reciprocal in softmax -> compare at 2e-2.
    max_err = float(jnp.max(jnp.abs(out - ref)))
    assert jnp.allclose(out, ref, atol=2e-2, rtol=2e-2), max_err
    print("KERNEL_OK")
</pallas_src>

<mosaic_0001>
module attributes {stable_mosaic.version = 11 : i64} {
  func.func @_vit_kernel(%arg0: i32, %arg1: memref<1x4x192xbf16, #tpu.memory_space<vmem>>, %arg2: memref<192x32xbf16, #tpu.memory_space<vmem>>, %arg3: memref<5x32xf32, #tpu.memory_space<vmem>>, %arg4: memref<2x6x32xf32, #tpu.memory_space<vmem>>, %arg5: memref<2x32x96xbf16, #tpu.memory_space<vmem>>, %arg6: memref<2x1x96xf32, #tpu.memory_space<vmem>>, %arg7: memref<2x32x32xbf16, #tpu.memory_space<vmem>>, %arg8: memref<2x32x64xbf16, #tpu.memory_space<vmem>>, %arg9: memref<2x1x64xf32, #tpu.memory_space<vmem>>, %arg10: memref<2x64x32xbf16, #tpu.memory_space<vmem>>, %arg11: memref<2x32xf32, #tpu.memory_space<vmem>>, %arg12: memref<1x4x32xf32, #tpu.memory_space<vmem>>) attributes {dimension_semantics = [#tpu.dimension_semantics<parallel>], iteration_bounds = array<i64: 2>, scalar_prefetch = 0 : i64, scratch_operands = 0 : i64, tpu.core_type = #tpu.core_type<tc>, window_params = [{transform_indices = @transform_0, window_bounds = array<i64: 1, 4, 192>}, {pipeline_mode = #tpu.pipeline_mode<synchronous>, transform_indices = @transform_1, window_bounds = array<i64: 192, 32>}, {pipeline_mode = #tpu.pipeline_mode<synchronous>, transform_indices = @transform_2, window_bounds = array<i64: 5, 32>}, {pipeline_mode = #tpu.pipeline_mode<synchronous>, transform_indices = @transform_3, window_bounds = array<i64: 2, 6, 32>}, {pipeline_mode = #tpu.pipeline_mode<synchronous>, transform_indices = @transform_4, window_bounds = array<i64: 2, 32, 96>}, {pipeline_mode = #tpu.pipeline_mode<synchronous>, transform_indices = @transform_5, window_bounds = array<i64: 2, 1, 96>}, {pipeline_mode = #tpu.pipeline_mode<synchronous>, transform_indices = @transform_6, window_bounds = array<i64: 2, 32, 32>}, {pipeline_mode = #tpu.pipeline_mode<synchronous>, transform_indices = @transform_7, window_bounds = array<i64: 2, 32, 64>}, {pipeline_mode = #tpu.pipeline_mode<synchronous>, transform_indices = @transform_8, window_bounds = array<i64: 2, 1, 64>}, {pipeline_mode = #tpu.pipeline_mode<synchronous>, transform_indices = @transform_9, window_bounds = array<i64: 2, 64, 32>}, {pipeline_mode = #tpu.pipeline_mode<synchronous>, transform_indices = @transform_10, window_bounds = array<i64: 2, 32>}, {transform_indices = @transform_11, window_bounds = array<i64: 1, 4, 32>}]} {
    %c0 = arith.constant 0 : index
    %c0_0 = arith.constant 0 : index
    %c0_1 = arith.constant 0 : index
    %0 = vector.load %arg1[%c0, %c0_0, %c0_1] : memref<1x4x192xbf16, #tpu.memory_space<vmem>>, vector<1x4x192xbf16>
    %1 = vector.shape_cast %0 : vector<1x4x192xbf16> to vector<4x192xbf16>
    %c0_2 = arith.constant 0 : index
    %c0_3 = arith.constant 0 : index
    %2 = vector.load %arg2[%c0_2, %c0_3] : memref<192x32xbf16, #tpu.memory_space<vmem>>, vector<192x32xbf16>
    %cst = arith.constant dense<0.000000e+00> : vector<4x32xf32>
    %3 = tpu.matmul %1, %2, %cst {dimension_numbers = #tpu.dot_dimension_numbers<[1], [0], [0], [1], [0, 0, 1, 1], [], []>} : vector<4x192xbf16>, vector<192x32xbf16>, vector<4x32xf32> -> vector<4x32xf32>
    %c0_4 = arith.constant 0 : index
    %c0_5 = arith.constant 0 : index
    %4 = vector.load %arg3[%c0_4, %c0_5] : memref<5x32xf32, #tpu.memory_space<vmem>>, vector<1x32xf32>
    %c1 = arith.constant 1 : index
    %c0_6 = arith.constant 0 : index
    %5 = vector.load %arg3[%c1, %c0_6] : memref<5x32xf32, #tpu.memory_space<vmem>>, vector<4x32xf32>
    %6 = arith.addf %3, %5 : vector<4x32xf32>
    %7 = tpu.concatenate %4, %6 in 0 : vector<1x32xf32>, vector<4x32xf32> -> vector<5x32xf32>
    %c0_7 = arith.constant 0 : index
    %c0_8 = arith.constant 0 : index
    %c0_9 = arith.constant 0 : index
    %8 = vector.load %arg4[%c0_7, %c0_8, %c0_9] : memref<2x6x32xf32, #tpu.memory_space<vmem>>, vector<1x1x32xf32>
    %9 = vector.shape_cast %8 : vector<1x1x32xf32> to vector<1x32xf32>
    %c0_10 = arith.constant 0 : index
    %c1_11 = arith.constant 1 : index
    %c0_12 = arith.constant 0 : index
    %10 = vector.load %arg4[%c0_10, %c1_11, %c0_12] : memref<2x6x32xf32, #tpu.memory_space<vmem>>, vector<1x1x32xf32>
    %11 = vector.shape_cast %10 : vector<1x1x32xf32> to vector<1x32xf32>
    %cst_13 = arith.constant dense<0.000000e+00> : vector<5xf32>
    %12 = vector.multi_reduction <add>, %7, %cst_13 [1] : vector<5x32xf32> to vector<5xf32>
    %13 = vector.shape_cast %12 : vector<5xf32> to vector<5x1xf32>
    %cst_14 = arith.constant 3.200000e+01 : f32
    %14 = vector.broadcast %cst_14 : f32 to vector<5x1xf32>
    %15 = arith.divf %13, %14 : vector<5x1xf32>
    %16 = vector.broadcast %15 : vector<5x1xf32> to vector<5x32xf32>
    %17 = arith.subf %7, %16 : vector<5x32xf32>
    %18 = arith.mulf %17, %17 : vector<5x32xf32>
    %cst_15 = arith.constant dense<0.000000e+00> : vector<5xf32>
    %19 = vector.multi_reduction <add>, %18, %cst_15 [1] : vector<5x32xf32> to vector<5xf32>
    %20 = vector.shape_cast %19 : vector<5xf32> to vector<5x1xf32>
    %cst_16 = arith.constant 3.200000e+01 : f32
    %21 = vector.broadcast %cst_16 : f32 to vector<5x1xf32>
    %22 = arith.divf %20, %21 : vector<5x1xf32>
    %23 = vector.broadcast %15 : vector<5x1xf32> to vector<5x32xf32>
    %24 = arith.subf %7, %23 : vector<5x32xf32>
    %cst_17 = arith.constant 9.99999996E-13 : f32
    %25 = vector.broadcast %cst_17 : f32 to vector<5x1xf32>
    %26 = arith.addf %22, %25 : vector<5x1xf32>
    %27 = math.rsqrt %26 : vector<5x1xf32>
    %28 = vector.broadcast %27 : vector<5x1xf32> to vector<5x32xf32>
    %29 = arith.mulf %24, %28 : vector<5x32xf32>
    %30 = vector.broadcast %9 : vector<1x32xf32> to vector<5x32xf32>
    %31 = arith.mulf %29, %30 : vector<5x32xf32>
    %32 = vector.broadcast %11 : vector<1x32xf32> to vector<5x32xf32>
    %33 = arith.addf %31, %32 : vector<5x32xf32>
    %34 = arith.truncf %33 : vector<5x32xf32> to vector<5x32xbf16>
    %c0_18 = arith.constant 0 : index
    %c0_19 = arith.constant 0 : index
    %c0_20 = arith.constant 0 : index
    %35 = vector.load %arg5[%c0_18, %c0_19, %c0_20] : memref<2x32x96xbf16, #tpu.memory_space<vmem>>, vector<1x32x96xbf16>
    %36 = vector.shape_cast %35 : vector<1x32x96xbf16> to vector<32x96xbf16>
    %cst_21 = arith.constant dense<0.000000e+00> : vector<5x96xf32>
    %37 = tpu.matmul %34, %36, %cst_21 {dimension_numbers = #tpu.dot_dimension_numbers<[1], [0], [0], [1], [0, 0, 1, 1], [], []>} : vector<5x32xbf16>, vector<32x96xbf16>, vector<5x96xf32> -> vector<5x96xf32>
    %c0_22 = arith.constant 0 : index
    %c0_23 = arith.constant 0 : index
    %c0_24 = arith.constant 0 : index
    %38 = vector.load %arg6[%c0_22, %c0_23, %c0_24] : memref<2x1x96xf32, #tpu.memory_space<vmem>>, vector<1x1x96xf32>
    %39 = vector.shape_cast %38 : vector<1x1x96xf32> to vector<1x96xf32>
    %40 = vector.broadcast %39 : vector<1x96xf32> to vector<5x96xf32>
    %41 = arith.addf %37, %40 : vector<5x96xf32>
    %42 = vector.extract_strided_slice %41 {offsets = [0, 0], sizes = [5, 16], strides = [1, 1]} : vector<5x96xf32> to vector<5x16xf32>
    %43 = vector.extract_strided_slice %41 {offsets = [0, 32], sizes = [5, 16], strides = [1, 1]} : vector<5x96xf32> to vector<5x16xf32>
    %44 = vector.extract_strided_slice %41 {offsets = [0, 64], sizes = [5, 16], strides = [1, 1]} : vector<5x96xf32> to vector<5x16xf32>
    %cst_25 = arith.constant dense<0.000000e+00> : vector<5x5xf32>
    %45 = tpu.matmul %42, %43, %cst_25 {dimension_numbers = #tpu.dot_dimension_numbers<[1], [1], [0], [0], [0, 0, 1, 0], [], []>} : vector<5x16xf32>, vector<5x16xf32>, vector<5x5xf32> -> vector<5x5xf32>
    %cst_26 = arith.constant 2.500000e-01 : f32
    %46 = vector.broadcast %cst_26 : f32 to vector<5x5xf32>
    %47 = arith.mulf %45, %46 : vector<5x5xf32>
    %cst_27 = arith.constant dense<0xFF800000> : vector<5xf32>
    %48 = vector.multi_reduction <maximumf>, %47, %cst_27 [1] : vector<5x5xf32> to vector<5xf32>
    %49 = vector.shape_cast %48 : vector<5xf32> to vector<5x1xf32>
    %50 = vector.broadcast %49 : vector<5x1xf32> to vector<5x5xf32>
    %51 = arith.subf %47, %50 : vector<5x5xf32>
    %52 = math.exp %51 : vector<5x5xf32>
    %cst_28 = arith.constant dense<0.000000e+00> : vector<5xf32>
    %53 = vector.multi_reduction <add>, %52, %cst_28 [1] : vector<5x5xf32> to vector<5xf32>
    %54 = vector.shape_cast %53 : vector<5xf32> to vector<5x1xf32>
    %55 = tpu.reciprocal %54 {approx = true} : vector<5x1xf32> -> vector<5x1xf32>
    %56 = vector.broadcast %55 : vector<5x1xf32> to vector<5x5xf32>
    %57 = arith.mulf %52, %56 : vector<5x5xf32>
    %cst_29 = arith.constant dense<0.000000e+00> : vector<5x16xf32>
    %58 = tpu.matmul %57, %44, %cst_29 {dimension_numbers = #tpu.dot_dimension_numbers<[1], [0], [0], [1], [0, 0, 1, 1], [], []>} : vector<5x5xf32>, vector<5x16xf32>, vector<5x16xf32> -> vector<5x16xf32>
    %59 = vector.extract_strided_slice %41 {offsets = [0, 16], sizes = [5, 16], strides = [1, 1]} : vector<5x96xf32> to vector<5x16xf32>
    %60 = vector.extract_strided_slice %41 {offsets = [0, 48], sizes = [5, 16], strides = [1, 1]} : vector<5x96xf32> to vector<5x16xf32>
    %61 = vector.extract_strided_slice %41 {offsets = [0, 80], sizes = [5, 16], strides = [1, 1]} : vector<5x96xf32> to vector<5x16xf32>
    %cst_30 = arith.constant dense<0.000000e+00> : vector<5x5xf32>
    %62 = tpu.matmul %59, %60, %cst_30 {dimension_numbers = #tpu.dot_dimension_numbers<[1], [1], [0], [0], [0, 0, 1, 0], [], []>} : vector<5x16xf32>, vector<5x16xf32>, vector<5x5xf32> -> vector<5x5xf32>
    %cst_31 = arith.constant 2.500000e-01 : f32
    %63 = vector.broadcast %cst_31 : f32 to vector<5x5xf32>
    %64 = arith.mulf %62, %63 : vector<5x5xf32>
    %cst_32 = arith.constant dense<0xFF800000> : vector<5xf32>
    %65 = vector.multi_reduction <maximumf>, %64, %cst_32 [1] : vector<5x5xf32> to vector<5xf32>
    %66 = vector.shape_cast %65 : vector<5xf32> to vector<5x1xf32>
    %67 = vector.broadcast %66 : vector<5x1xf32> to vector<5x5xf32>
    %68 = arith.subf %64, %67 : vector<5x5xf32>
    %69 = math.exp %68 : vector<5x5xf32>
    %cst_33 = arith.constant dense<0.000000e+00> : vector<5xf32>
    %70 = vector.multi_reduction <add>, %69, %cst_33 [1] : vector<5x5xf32> to vector<5xf32>
    %71 = vector.shape_cast %70 : vector<5xf32> to vector<5x1xf32>
    %72 = tpu.reciprocal %71 {approx = true} : vector<5x1xf32> -> vector<5x1xf32>
    %73 = vector.broadcast %72 : vector<5x1xf32> to vector<5x5xf32>
    %74 = arith.mulf %69, %73 : vector<5x5xf32>
    %cst_34 = arith.constant dense<0.000000e+00> : vector<5x16xf32>
    %75 = tpu.matmul %74, %61, %cst_34 {dimension_numbers = #tpu.dot_dimension_numbers<[1], [0], [0], [1], [0, 0, 1, 1], [], []>} : vector<5x5xf32>, vector<5x16xf32>, vector<5x16xf32> -> vector<5x16xf32>
    %76 = tpu.concatenate %58, %75 in 1 : vector<5x16xf32>, vector<5x16xf32> -> vector<5x32xf32>
    %77 = arith.truncf %76 : vector<5x32xf32> to vector<5x32xbf16>
    %c0_35 = arith.constant 0 : index
    %c0_36 = arith.constant 0 : index
    %c0_37 = arith.constant 0 : index
    %78 = vector.load %arg7[%c0_35, %c0_36, %c0_37] : memref<2x32x32xbf16, #tpu.memory_space<vmem>>, vector<1x32x32xbf16>
    %79 = vector.shape_cast %78 : vector<1x32x32xbf16> to vector<32x32xbf16>
    %cst_38 = arith.constant dense<0.000000e+00> : vector<5x32xf32>
    %80 = tpu.matmul %77, %79, %cst_38 {dimension_numbers = #tpu.dot_dimension_numbers<[1], [0], [0], [1], [0, 0, 1, 1], [], []>} : vector<5x32xbf16>, vector<32x32xbf16>, vector<5x32xf32> -> vector<5x32xf32>
    %c0_39 = arith.constant 0 : index
    %c4 = arith.constant 4 : index
    %c0_40 = arith.constant 0 : index
    %81 = vector.load %arg4[%c0_39, %c4, %c0_40] : memref<2x6x32xf32, #tpu.memory_space<vmem>>, vector<1x1x32xf32>
    %82 = vector.shape_cast %81 : vector<1x1x32xf32> to vector<1x32xf32>
    %83 = vector.broadcast %82 : vector<1x32xf32> to vector<5x32xf32>
    %84 = arith.addf %80, %83 : vector<5x32xf32>
    %85 = arith.addf %7, %84 : vector<5x32xf32>
    %c0_41 = arith.constant 0 : index
    %c2 = arith.constant 2 : index
    %c0_42 = arith.constant 0 : index
    %86 = vector.load %arg4[%c0_41, %c2, %c0_42] : memref<2x6x32xf32, #tpu.memory_space<vmem>>, vector<1x1x32xf32>
    %87 = vector.shape_cast %86 : vector<1x1x32xf32> to vector<1x32xf32>
    %c0_43 = arith.constant 0 : index
    %c3 = arith.constant 3 : index
    %c0_44 = arith.constant 0 : index
    %88 = vector.load %arg4[%c0_43, %c3, %c0_44] : memref<2x6x32xf32, #tpu.memory_space<vmem>>, vector<1x1x32xf32>
    %89 = vector.shape_cast %88 : vector<1x1x32xf32> to vector<1x32xf32>
    %cst_45 = arith.constant dense<0.000000e+00> : vector<5xf32>
    %90 = vector.multi_reduction <add>, %85, %cst_45 [1] : vector<5x32xf32> to vector<5xf32>
    %91 = vector.shape_cast %90 : vector<5xf32> to vector<5x1xf32>
    %cst_46 = arith.constant 3.200000e+01 : f32
    %92 = vector.broadcast %cst_46 : f32 to vector<5x1xf32>
    %93 = arith.divf %91, %92 : vector<5x1xf32>
    %94 = vector.broadcast %93 : vector<5x1xf32> to vector<5x32xf32>
    %95 = arith.subf %85, %94 : vector<5x32xf32>
    %96 = arith.mulf %95, %95 : vector<5x32xf32>
    %cst_47 = arith.constant dense<0.000000e+00> : vector<5xf32>
    %97 = vector.multi_reduction <add>, %96, %cst_47 [1] : vector<5x32xf32> to vector<5xf32>
    %98 = vector.shape_cast %97 : vector<5xf32> to vector<5x1xf32>
    %cst_48 = arith.constant 3.200000e+01 : f32
    %99 = vector.broadcast %cst_48 : f32 to vector<5x1xf32>
    %100 = arith.divf %98, %99 : vector<5x1xf32>
    %101 = vector.broadcast %93 : vector<5x1xf32> to vector<5x32xf32>
    %102 = arith.subf %85, %101 : vector<5x32xf32>
    %cst_49 = arith.constant 9.99999996E-13 : f32
    %103 = vector.broadcast %cst_49 : f32 to vector<5x1xf32>
    %104 = arith.addf %100, %103 : vector<5x1xf32>
    %105 = math.rsqrt %104 : vector<5x1xf32>
    %106 = vector.broadcast %105 : vector<5x1xf32> to vector<5x32xf32>
    %107 = arith.mulf %102, %106 : vector<5x32xf32>
    %108 = vector.broadcast %87 : vector<1x32xf32> to vector<5x32xf32>
    %109 = arith.mulf %107, %108 : vector<5x32xf32>
    %110 = vector.broadcast %89 : vector<1x32xf32> to vector<5x32xf32>
    %111 = arith.addf %109, %110 : vector<5x32xf32>
    %112 = arith.truncf %111 : vector<5x32xf32> to vector<5x32xbf16>
    %c0_50 = arith.constant 0 : index
    %c0_51 = arith.constant 0 : index
    %c0_52 = arith.constant 0 : index
    %113 = vector.load %arg8[%c0_50, %c0_51, %c0_52] : memref<2x32x64xbf16, #tpu.memory_space<vmem>>, vector<1x32x64xbf16>
    %114 = vector.shape_cast %113 : vector<1x32x64xbf16> to vector<32x64xbf16>
    %cst_53 = arith.constant dense<0.000000e+00> : vector<5x64xf32>
    %115 = tpu.matmul %112, %114, %cst_53 {dimension_numbers = #tpu.dot_dimension_numbers<[1], [0], [0], [1], [0, 0, 1, 1], [], []>} : vector<5x32xbf16>, vector<32x64xbf16>, vector<5x64xf32> -> vector<5x64xf32>
    %c0_54 = arith.constant 0 : index
    %c0_55 = arith.constant 0 : index
    %c0_56 = arith.constant 0 : index
    %116 = vector.load %arg9[%c0_54, %c0_55, %c0_56] : memref<2x1x64xf32, #tpu.memory_space<vmem>>, vector<1x1x64xf32>
    %117 = vector.shape_cast %116 : vector<1x1x64xf32> to vector<1x64xf32>
    %118 = vector.broadcast %117 : vector<1x64xf32> to vector<5x64xf32>
    %119 = arith.addf %115, %118 : vector<5x64xf32>
    %cst_57 = arith.constant 5.000000e-01 : f32
    %120 = vector.broadcast %cst_57 : f32 to vector<5x64xf32>
    %121 = arith.mulf %120, %119 : vector<5x64xf32>
    %cst_58 = arith.constant 4.471500e-02 : f32
    %122 = vector.broadcast %cst_58 : f32 to vector<5x64xf32>
    %123 = arith.mulf %122, %119 : vector<5x64xf32>
    %124 = arith.mulf %123, %119 : vector<5x64xf32>
    %125 = arith.mulf %124, %119 : vector<5x64xf32>
    %126 = arith.addf %119, %125 : vector<5x64xf32>
    %cst_59 = arith.constant 0.797884583 : f32
    %127 = vector.broadcast %cst_59 : f32 to vector<5x64xf32>
    %128 = arith.mulf %127, %126 : vector<5x64xf32>
    %129 = math.tanh %128 : vector<5x64xf32>
    %cst_60 = arith.constant 1.000000e+00 : f32
    %130 = vector.broadcast %cst_60 : f32 to vector<5x64xf32>
    %131 = arith.addf %130, %129 : vector<5x64xf32>
    %132 = arith.mulf %121, %131 : vector<5x64xf32>
    %133 = arith.truncf %132 : vector<5x64xf32> to vector<5x64xbf16>
    %c0_61 = arith.constant 0 : index
    %c0_62 = arith.constant 0 : index
    %c0_63 = arith.constant 0 : index
    %134 = vector.load %arg10[%c0_61, %c0_62, %c0_63] : memref<2x64x32xbf16, #tpu.memory_space<vmem>>, vector<1x64x32xbf16>
    %135 = vector.shape_cast %134 : vector<1x64x32xbf16> to vector<64x32xbf16>
    %cst_64 = arith.constant dense<0.000000e+00> : vector<5x32xf32>
    %136 = tpu.matmul %133, %135, %cst_64 {dimension_numbers = #tpu.dot_dimension_numbers<[1], [0], [0], [1], [0, 0, 1, 1], [], []>} : vector<5x64xbf16>, vector<64x32xbf16>, vector<5x32xf32> -> vector<5x32xf32>
    %c0_65 = arith.constant 0 : index
    %c5 = arith.constant 5 : index
    %c0_66 = arith.constant 0 : index
    %137 = vector.load %arg4[%c0_65, %c5, %c0_66] : memref<2x6x32xf32, #tpu.memory_space<vmem>>, vector<1x1x32xf32>
    %138 = vector.shape_cast %137 : vector<1x1x32xf32> to vector<1x32xf32>
    %139 = vector.broadcast %138 : vector<1x32xf32> to vector<5x32xf32>
    %140 = arith.addf %136, %139 : vector<5x32xf32>
    %141 = arith.addf %85, %140 : vector<5x32xf32>
    %c1_67 = arith.constant 1 : index
    %c0_68 = arith.constant 0 : index
    %c0_69 = arith.constant 0 : index
    %142 = vector.load %arg4[%c1_67, %c0_68, %c0_69] : memref<2x6x32xf32, #tpu.memory_space<vmem>>, vector<1x1x32xf32>
    %143 = vector.shape_cast %142 : vector<1x1x32xf32> to vector<1x32xf32>
    %c1_70 = arith.constant 1 : index
    %c1_71 = arith.constant 1 : index
    %c0_72 = arith.constant 0 : index
    %144 = vector.load %arg4[%c1_70, %c1_71, %c0_72] : memref<2x6x32xf32, #tpu.memory_space<vmem>>, vector<1x1x32xf32>
    %145 = vector.shape_cast %144 : vector<1x1x32xf32> to vector<1x32xf32>
    %cst_73 = arith.constant dense<0.000000e+00> : vector<5xf32>
    %146 = vector.multi_reduction <add>, %141, %cst_73 [1] : vector<5x32xf32> to vector<5xf32>
    %147 = vector.shape_cast %146 : vector<5xf32> to vector<5x1xf32>
    %cst_74 = arith.constant 3.200000e+01 : f32
    %148 = vector.broadcast %cst_74 : f32 to vector<5x1xf32>
    %149 = arith.divf %147, %148 : vector<5x1xf32>
    %150 = vector.broadcast %149 : vector<5x1xf32> to vector<5x32xf32>
    %151 = arith.subf %141, %150 : vector<5x32xf32>
    %152 = arith.mulf %151, %151 : vector<5x32xf32>
    %cst_75 = arith.constant dense<0.000000e+00> : vector<5xf32>
    %153 = vector.multi_reduction <add>, %152, %cst_75 [1] : vector<5x32xf32> to vector<5xf32>
    %154 = vector.shape_cast %153 : vector<5xf32> to vector<5x1xf32>
    %cst_76 = arith.constant 3.200000e+01 : f32
    %155 = vector.broadcast %cst_76 : f32 to vector<5x1xf32>
    %156 = arith.divf %154, %155 : vector<5x1xf32>
    %157 = vector.broadcast %149 : vector<5x1xf32> to vector<5x32xf32>
    %158 = arith.subf %141, %157 : vector<5x32xf32>
    %cst_77 = arith.constant 9.99999996E-13 : f32
    %159 = vector.broadcast %cst_77 : f32 to vector<5x1xf32>
    %160 = arith.addf %156, %159 : vector<5x1xf32>
    %161 = math.rsqrt %160 : vector<5x1xf32>
    %162 = vector.broadcast %161 : vector<5x1xf32> to vector<5x32xf32>
    %163 = arith.mulf %158, %162 : vector<5x32xf32>
    %164 = vector.broadcast %143 : vector<1x32xf32> to vector<5x32xf32>
    %165 = arith.mulf %163, %164 : vector<5x32xf32>
    %166 = vector.broadcast %145 : vector<1x32xf32> to vector<5x32xf32>
    %167 = arith.addf %165, %166 : vector<5x32xf32>
    %168 = arith.truncf %167 : vector<5x32xf32> to vector<5x32xbf16>
    %c1_78 = arith.constant 1 : index
    %c0_79 = arith.constant 0 : index
    %c0_80 = arith.constant 0 : index
    %169 = vector.load %arg5[%c1_78, %c0_79, %c0_80] : memref<2x32x96xbf16, #tpu.memory_space<vmem>>, vector<1x32x96xbf16>
    %170 = vector.shape_cast %169 : vector<1x32x96xbf16> to vector<32x96xbf16>
    %cst_81 = arith.constant dense<0.000000e+00> : vector<5x96xf32>
    %171 = tpu.matmul %168, %170, %cst_81 {dimension_numbers = #tpu.dot_dimension_numbers<[1], [0], [0], [1], [0, 0, 1, 1], [], []>} : vector<5x32xbf16>, vector<32x96xbf16>, vector<5x96xf32> -> vector<5x96xf32>
    %c1_82 = arith.constant 1 : index
    %c0_83 = arith.constant 0 : index
    %c0_84 = arith.constant 0 : index
    %172 = vector.load %arg6[%c1_82, %c0_83, %c0_84] : memref<2x1x96xf32, #tpu.memory_space<vmem>>, vector<1x1x96xf32>
    %173 = vector.shape_cast %172 : vector<1x1x96xf32> to vector<1x96xf32>
    %174 = vector.broadcast %173 : vector<1x96xf32> to vector<5x96xf32>
    %175 = arith.addf %171, %174 : vector<5x96xf32>
    %176 = vector.extract_strided_slice %175 {offsets = [0, 0], sizes = [5, 16], strides = [1, 1]} : vector<5x96xf32> to vector<5x16xf32>
    %177 = vector.extract_strided_slice %175 {offsets = [0, 32], sizes = [5, 16], strides = [1, 1]} : vector<5x96xf32> to vector<5x16xf32>
    %178 = vector.extract_strided_slice %175 {offsets = [0, 64], sizes = [5, 16], strides = [1, 1]} : vector<5x96xf32> to vector<5x16xf32>
    %cst_85 = arith.constant dense<0.000000e+00> : vector<5x5xf32>
    %179 = tpu.matmul %176, %177, %cst_85 {dimension_numbers = #tpu.dot_dimension_numbers<[1], [1], [0], [0], [0, 0, 1, 0], [], []>} : vector<5x16xf32>, vector<5x16xf32>, vector<5x5xf32> -> vector<5x5xf32>
    %cst_86 = arith.constant 2.500000e-01 : f32
    %180 = vector.broadcast %cst_86 : f32 to vector<5x5xf32>
    %181 = arith.mulf %179, %180 : vector<5x5xf32>
    %cst_87 = arith.constant dense<0xFF800000> : vector<5xf32>
    %182 = vector.multi_reduction <maximumf>, %181, %cst_87 [1] : vector<5x5xf32> to vector<5xf32>
    %183 = vector.shape_cast %182 : vector<5xf32> to vector<5x1xf32>
    %184 = vector.broadcast %183 : vector<5x1xf32> to vector<5x5xf32>
    %185 = arith.subf %181, %184 : vector<5x5xf32>
    %186 = math.exp %185 : vector<5x5xf32>
    %cst_88 = arith.constant dense<0.000000e+00> : vector<5xf32>
    %187 = vector.multi_reduction <add>, %186, %cst_88 [1] : vector<5x5xf32> to vector<5xf32>
    %188 = vector.shape_cast %187 : vector<5xf32> to vector<5x1xf32>
    %189 = tpu.reciprocal %188 {approx = true} : vector<5x1xf32> -> vector<5x1xf32>
    %190 = vector.broadcast %189 : vector<5x1xf32> to vector<5x5xf32>
    %191 = arith.mulf %186, %190 : vector<5x5xf32>
    %cst_89 = arith.constant dense<0.000000e+00> : vector<5x16xf32>
    %192 = tpu.matmul %191, %178, %cst_89 {dimension_numbers = #tpu.dot_dimension_numbers<[1], [0], [0], [1], [0, 0, 1, 1], [], []>} : vector<5x5xf32>, vector<5x16xf32>, vector<5x16xf32> -> vector<5x16xf32>
    %193 = vector.extract_strided_slice %175 {offsets = [0, 16], sizes = [5, 16], strides = [1, 1]} : vector<5x96xf32> to vector<5x16xf32>
    %194 = vector.extract_strided_slice %175 {offsets = [0, 48], sizes = [5, 16], strides = [1, 1]} : vector<5x96xf32> to vector<5x16xf32>
    %195 = vector.extract_strided_slice %175 {offsets = [0, 80], sizes = [5, 16], strides = [1, 1]} : vector<5x96xf32> to vector<5x16xf32>
    %cst_90 = arith.constant dense<0.000000e+00> : vector<5x5xf32>
    %196 = tpu.matmul %193, %194, %cst_90 {dimension_numbers = #tpu.dot_dimension_numbers<[1], [1], [0], [0], [0, 0, 1, 0], [], []>} : vector<5x16xf32>, vector<5x16xf32>, vector<5x5xf32> -> vector<5x5xf32>
    %cst_91 = arith.constant 2.500000e-01 : f32
    %197 = vector.broadcast %cst_91 : f32 to vector<5x5xf32>
    %198 = arith.mulf %196, %197 : vector<5x5xf32>
    %cst_92 = arith.constant dense<0xFF800000> : vector<5xf32>
    %199 = vector.multi_reduction <maximumf>, %198, %cst_92 [1] : vector<5x5xf32> to vector<5xf32>
    %200 = vector.shape_cast %199 : vector<5xf32> to vector<5x1xf32>
    %201 = vector.broadcast %200 : vector<5x1xf32> to vector<5x5xf32>
    %202 = arith.subf %198, %201 : vector<5x5xf32>
    %203 = math.exp %202 : vector<5x5xf32>
    %cst_93 = arith.constant dense<0.000000e+00> : vector<5xf32>
    %204 = vector.multi_reduction <add>, %203, %cst_93 [1] : vector<5x5xf32> to vector<5xf32>
    %205 = vector.shape_cast %204 : vector<5xf32> to vector<5x1xf32>
    %206 = tpu.reciprocal %205 {approx = true} : vector<5x1xf32> -> vector<5x1xf32>
    %207 = vector.broadcast %206 : vector<5x1xf32> to vector<5x5xf32>
    %208 = arith.mulf %203, %207 : vector<5x5xf32>
    %cst_94 = arith.constant dense<0.000000e+00> : vector<5x16xf32>
    %209 = tpu.matmul %208, %195, %cst_94 {dimension_numbers = #tpu.dot_dimension_numbers<[1], [0], [0], [1], [0, 0, 1, 1], [], []>} : vector<5x5xf32>, vector<5x16xf32>, vector<5x16xf32> -> vector<5x16xf32>
    %210 = tpu.concatenate %192, %209 in 1 : vector<5x16xf32>, vector<5x16xf32> -> vector<5x32xf32>
    %211 = arith.truncf %210 : vector<5x32xf32> to vector<5x32xbf16>
    %c1_95 = arith.constant 1 : index
    %c0_96 = arith.constant 0 : index
    %c0_97 = arith.constant 0 : index
    %212 = vector.load %arg7[%c1_95, %c0_96, %c0_97] : memref<2x32x32xbf16, #tpu.memory_space<vmem>>, vector<1x32x32xbf16>
    %213 = vector.shape_cast %212 : vector<1x32x32xbf16> to vector<32x32xbf16>
    %cst_98 = arith.constant dense<0.000000e+00> : vector<5x32xf32>
    %214 = tpu.matmul %211, %213, %cst_98 {dimension_numbers = #tpu.dot_dimension_numbers<[1], [0], [0], [1], [0, 0, 1, 1], [], []>} : vector<5x32xbf16>, vector<32x32xbf16>, vector<5x32xf32> -> vector<5x32xf32>
    %c1_99 = arith.constant 1 : index
    %c4_100 = arith.constant 4 : index
    %c0_101 = arith.constant 0 : index
    %215 = vector.load %arg4[%c1_99, %c4_100, %c0_101] : memref<2x6x32xf32, #tpu.memory_space<vmem>>, vector<1x1x32xf32>
    %216 = vector.shape_cast %215 : vector<1x1x32xf32> to vector<1x32xf32>
    %217 = vector.broadcast %216 : vector<1x32xf32> to vector<5x32xf32>
    %218 = arith.addf %214, %217 : vector<5x32xf32>
    %219 = arith.addf %141, %218 : vector<5x32xf32>
    %c1_102 = arith.constant 1 : index
    %c2_103 = arith.constant 2 : index
    %c0_104 = arith.constant 0 : index
    %220 = vector.load %arg4[%c1_102, %c2_103, %c0_104] : memref<2x6x32xf32, #tpu.memory_space<vmem>>, vector<1x1x32xf32>
    %221 = vector.shape_cast %220 : vector<1x1x32xf32> to vector<1x32xf32>
    %c1_105 = arith.constant 1 : index
    %c3_106 = arith.constant 3 : index
    %c0_107 = arith.constant 0 : index
    %222 = vector.load %arg4[%c1_105, %c3_106, %c0_107] : memref<2x6x32xf32, #tpu.memory_space<vmem>>, vector<1x1x32xf32>
    %223 = vector.shape_cast %222 : vector<1x1x32xf32> to vector<1x32xf32>
    %cst_108 = arith.constant dense<0.000000e+00> : vector<5xf32>
    %224 = vector.multi_reduction <add>, %219, %cst_108 [1] : vector<5x32xf32> to vector<5xf32>
    %225 = vector.shape_cast %224 : vector<5xf32> to vector<5x1xf32>
    %cst_109 = arith.constant 3.200000e+01 : f32
    %226 = vector.broadcast %cst_109 : f32 to vector<5x1xf32>
    %227 = arith.divf %225, %226 : vector<5x1xf32>
    %228 = vector.broadcast %227 : vector<5x1xf32> to vector<5x32xf32>
    %229 = arith.subf %219, %228 : vector<5x32xf32>
    %230 = arith.mulf %229, %229 : vector<5x32xf32>
    %cst_110 = arith.constant dense<0.000000e+00> : vector<5xf32>
    %231 = vector.multi_reduction <add>, %230, %cst_110 [1] : vector<5x32xf32> to vector<5xf32>
    %232 = vector.shape_cast %231 : vector<5xf32> to vector<5x1xf32>
    %cst_111 = arith.constant 3.200000e+01 : f32
    %233 = vector.broadcast %cst_111 : f32 to vector<5x1xf32>
    %234 = arith.divf %232, %233 : vector<5x1xf32>
    %235 = vector.broadcast %227 : vector<5x1xf32> to vector<5x32xf32>
    %236 = arith.subf %219, %235 : vector<5x32xf32>
    %cst_112 = arith.constant 9.99999996E-13 : f32
    %237 = vector.broadcast %cst_112 : f32 to vector<5x1xf32>
    %238 = arith.addf %234, %237 : vector<5x1xf32>
    %239 = math.rsqrt %238 : vector<5x1xf32>
    %240 = vector.broadcast %239 : vector<5x1xf32> to vector<5x32xf32>
    %241 = arith.mulf %236, %240 : vector<5x32xf32>
    %242 = vector.broadcast %221 : vector<1x32xf32> to vector<5x32xf32>
    %243 = arith.mulf %241, %242 : vector<5x32xf32>
    %244 = vector.broadcast %223 : vector<1x32xf32> to vector<5x32xf32>
    %245 = arith.addf %243, %244 : vector<5x32xf32>
    %246 = arith.truncf %245 : vector<5x32xf32> to vector<5x32xbf16>
    %c1_113 = arith.constant 1 : index
    %c0_114 = arith.constant 0 : index
    %c0_115 = arith.constant 0 : index
    %247 = vector.load %arg8[%c1_113, %c0_114, %c0_115] : memref<2x32x64xbf16, #tpu.memory_space<vmem>>, vector<1x32x64xbf16>
    %248 = vector.shape_cast %247 : vector<1x32x64xbf16> to vector<32x64xbf16>
    %cst_116 = arith.constant dense<0.000000e+00> : vector<5x64xf32>
    %249 = tpu.matmul %246, %248, %cst_116 {dimension_numbers = #tpu.dot_dimension_numbers<[1], [0], [0], [1], [0, 0, 1, 1], [], []>} : vector<5x32xbf16>, vector<32x64xbf16>, vector<5x64xf32> -> vector<5x64xf32>
    %c1_117 = arith.constant 1 : index
    %c0_118 = arith.constant 0 : index
    %c0_119 = arith.constant 0 : index
    %250 = vector.load %arg9[%c1_117, %c0_118, %c0_119] : memref<2x1x64xf32, #tpu.memory_space<vmem>>, vector<1x1x64xf32>
    %251 = vector.shape_cast %250 : vector<1x1x64xf32> to vector<1x64xf32>
    %252 = vector.broadcast %251 : vector<1x64xf32> to vector<5x64xf32>
    %253 = arith.addf %249, %252 : vector<5x64xf32>
    %cst_120 = arith.constant 5.000000e-01 : f32
    %254 = vector.broadcast %cst_120 : f32 to vector<5x64xf32>
    %255 = arith.mulf %254, %253 : vector<5x64xf32>
    %cst_121 = arith.constant 4.471500e-02 : f32
    %256 = vector.broadcast %cst_121 : f32 to vector<5x64xf32>
    %257 = arith.mulf %256, %253 : vector<5x64xf32>
    %258 = arith.mulf %257, %253 : vector<5x64xf32>
    %259 = arith.mulf %258, %253 : vector<5x64xf32>
    %260 = arith.addf %253, %259 : vector<5x64xf32>
    %cst_122 = arith.constant 0.797884583 : f32
    %261 = vector.broadcast %cst_122 : f32 to vector<5x64xf32>
    %262 = arith.mulf %261, %260 : vector<5x64xf32>
    %263 = math.tanh %262 : vector<5x64xf32>
    %cst_123 = arith.constant 1.000000e+00 : f32
    %264 = vector.broadcast %cst_123 : f32 to vector<5x64xf32>
    %265 = arith.addf %264, %263 : vector<5x64xf32>
    %266 = arith.mulf %255, %265 : vector<5x64xf32>
    %267 = arith.truncf %266 : vector<5x64xf32> to vector<5x64xbf16>
    %c1_124 = arith.constant 1 : index
    %c0_125 = arith.constant 0 : index
    %c0_126 = arith.constant 0 : index
    %268 = vector.load %arg10[%c1_124, %c0_125, %c0_126] : memref<2x64x32xbf16, #tpu.memory_space<vmem>>, vector<1x64x32xbf16>
    %269 = vector.shape_cast %268 : vector<1x64x32xbf16> to vector<64x32xbf16>
    %cst_127 = arith.constant dense<0.000000e+00> : vector<5x32xf32>
    %270 = tpu.matmul %267, %269, %cst_127 {dimension_numbers = #tpu.dot_dimension_numbers<[1], [0], [0], [1], [0, 0, 1, 1], [], []>} : vector<5x64xbf16>, vector<64x32xbf16>, vector<5x32xf32> -> vector<5x32xf32>
    %c1_128 = arith.constant 1 : index
    %c5_129 = arith.constant 5 : index
    %c0_130 = arith.constant 0 : index
    %271 = vector.load %arg4[%c1_128, %c5_129, %c0_130] : memref<2x6x32xf32, #tpu.memory_space<vmem>>, vector<1x1x32xf32>
    %272 = vector.shape_cast %271 : vector<1x1x32xf32> to vector<1x32xf32>
    %273 = vector.broadcast %272 : vector<1x32xf32> to vector<5x32xf32>
    %274 = arith.addf %270, %273 : vector<5x32xf32>
    %275 = arith.addf %219, %274 : vector<5x32xf32>
    %c0_131 = arith.constant 0 : index
    %c0_132 = arith.constant 0 : index
    %276 = vector.load %arg11[%c0_131, %c0_132] : memref<2x32xf32, #tpu.memory_space<vmem>>, vector<1x32xf32>
    %c1_133 = arith.constant 1 : index
    %c0_134 = arith.constant 0 : index
    %277 = vector.load %arg11[%c1_133, %c0_134] : memref<2x32xf32, #tpu.memory_space<vmem>>, vector<1x32xf32>
    %cst_135 = arith.constant dense<0.000000e+00> : vector<5xf32>
    %278 = vector.multi_reduction <add>, %275, %cst_135 [1] : vector<5x32xf32> to vector<5xf32>
    %279 = vector.shape_cast %278 : vector<5xf32> to vector<5x1xf32>
    %cst_136 = arith.constant 3.200000e+01 : f32
    %280 = vector.broadcast %cst_136 : f32 to vector<5x1xf32>
    %281 = arith.divf %279, %280 : vector<5x1xf32>
    %282 = vector.broadcast %281 : vector<5x1xf32> to vector<5x32xf32>
    %283 = arith.subf %275, %282 : vector<5x32xf32>
    %284 = arith.mulf %283, %283 : vector<5x32xf32>
    %cst_137 = arith.constant dense<0.000000e+00> : vector<5xf32>
    %285 = vector.multi_reduction <add>, %284, %cst_137 [1] : vector<5x32xf32> to vector<5xf32>
    %286 = vector.shape_cast %285 : vector<5xf32> to vector<5x1xf32>
    %cst_138 = arith.constant 3.200000e+01 : f32
    %287 = vector.broadcast %cst_138 : f32 to vector<5x1xf32>
    %288 = arith.divf %286, %287 : vector<5x1xf32>
    %289 = vector.broadcast %281 : vector<5x1xf32> to vector<5x32xf32>
    %290 = arith.subf %275, %289 : vector<5x32xf32>
    %cst_139 = arith.constant 9.99999996E-13 : f32
    %291 = vector.broadcast %cst_139 : f32 to vector<5x1xf32>
    %292 = arith.addf %288, %291 : vector<5x1xf32>
    %293 = math.rsqrt %292 : vector<5x1xf32>
    %294 = vector.broadcast %293 : vector<5x1xf32> to vector<5x32xf32>
    %295 = arith.mulf %290, %294 : vector<5x32xf32>
    %296 = vector.broadcast %276 : vector<1x32xf32> to vector<5x32xf32>
    %297 = arith.mulf %295, %296 : vector<5x32xf32>
    %298 = vector.broadcast %277 : vector<1x32xf32> to vector<5x32xf32>
    %299 = arith.addf %297, %298 : vector<5x32xf32>
    %300 = vector.extract_strided_slice %299 {offsets = [1, 0], sizes = [4, 32], strides = [1, 1]} : vector<5x32xf32> to vector<4x32xf32>
    %c0_140 = arith.constant 0 : index
    %c0_141 = arith.constant 0 : index
    %c0_142 = arith.constant 0 : index
    %301 = vector.load %arg12[%c0_140, %c0_141, %c0_142] : memref<1x4x32xf32, #tpu.memory_space<vmem>>, vector<1x4x32xf32>
    %302 = vector.shape_cast %301 : vector<1x4x32xf32> to vector<4x32xf32>
    %303 = vector.shape_cast %300 : vector<4x32xf32> to vector<1x4x32xf32>
    tpu.vector_store %arg12[%c0_140, %c0_141, %c0_142], %303 {strides = array<i32>} : memref<1x4x32xf32, #tpu.memory_space<vmem>>, vector<1x4x32xf32>,
    return
  }
  func.func @transform_0(%arg0: i32) -> (i32, i32, i32) {
    %c0_i32 = arith.constant 0 : i32
    %c0_i32_0 = arith.constant 0 : i32
    %c0_i32_1 = arith.constant 0 : i32
    return %arg0, %c0_i32, %c0_i32_0 : i32, i32, i32
  }
  func.func @transform_1(%arg0: i32) -> (i32, i32) {
    %c0_i32 = arith.constant 0 : i32
    %c0_i32_0 = arith.constant 0 : i32
    %c0_i32_1 = arith.constant 0 : i32
    return %c0_i32, %c0_i32_0 : i32, i32
  }
  func.func @transform_2(%arg0: i32) -> (i32, i32) {
    %c0_i32 = arith.constant 0 : i32
    %c0_i32_0 = arith.constant 0 : i32
    %c0_i32_1 = arith.constant 0 : i32
    return %c0_i32, %c0_i32_0 : i32, i32
  }
  func.func @transform_3(%arg0: i32) -> (i32, i32, i32) {
    %c0_i32 = arith.constant 0 : i32
    %c0_i32_0 = arith.constant 0 : i32
    %c0_i32_1 = arith.constant 0 : i32
    %c0_i32_2 = arith.constant 0 : i32
    return %c0_i32, %c0_i32_0, %c0_i32_1 : i32, i32, i32
  }
  func.func @transform_4(%arg0: i32) -> (i32, i32, i32) {
    %c0_i32 = arith.constant 0 : i32
    %c0_i32_0 = arith.constant 0 : i32
    %c0_i32_1 = arith.constant 0 : i32
    %c0_i32_2 = arith.constant 0 : i32
    return %c0_i32, %c0_i32_0, %c0_i32_1 : i32, i32, i32
  }
  func.func @transform_5(%arg0: i32) -> (i32, i32, i32) {
    %c0_i32 = arith.constant 0 : i32
    %c0_i32_0 = arith.constant 0 : i32
    %c0_i32_1 = arith.constant 0 : i32
    %c0_i32_2 = arith.constant 0 : i32
    return %c0_i32, %c0_i32_0, %c0_i32_1 : i32, i32, i32
  }
  func.func @transform_6(%arg0: i32) -> (i32, i32, i32) {
    %c0_i32 = arith.constant 0 : i32
    %c0_i32_0 = arith.constant 0 : i32
    %c0_i32_1 = arith.constant 0 : i32
    %c0_i32_2 = arith.constant 0 : i32
    return %c0_i32, %c0_i32_0, %c0_i32_1 : i32, i32, i32
  }
  func.func @transform_7(%arg0: i32) -> (i32, i32, i32) {
    %c0_i32 = arith.constant 0 : i32
    %c0_i32_0 = arith.constant 0 : i32
    %c0_i32_1 = arith.constant 0 : i32
    %c0_i32_2 = arith.constant 0 : i32
    return %c0_i32, %c0_i32_0, %c0_i32_1 : i32, i32, i32
  }
  func.func @transform_8(%arg0: i32) -> (i32, i32, i32) {
    %c0_i32 = arith.constant 0 : i32
    %c0_i32_0 = arith.constant 0 : i32
    %c0_i32_1 = arith.constant 0 : i32
    %c0_i32_2 = arith.constant 0 : i32
    return %c0_i32, %c0_i32_0, %c0_i32_1 : i32, i32, i32
  }
  func.func @transform_9(%arg0: i32) -> (i32, i32, i32) {
    %c0_i32 = arith.constant 0 : i32
    %c0_i32_0 = arith.constant 0 : i32
    %c0_i32_1 = arith.constant 0 : i32
    %c0_i32_2 = arith.constant 0 : i32
    return %c0_i32, %c0_i32_0, %c0_i32_1 : i32, i32, i32
  }
  func.func @transform_10(%arg0: i32) -> (i32, i32) {
    %c0_i32 = arith.constant 0 : i32
    %c0_i32_0 = arith.constant 0 : i32
    %c0_i32_1 = arith.constant 0 : i32
    return %c0_i32, %c0_i32_0 : i32, i32
  }
  func.func @transform_11(%arg0: i32) -> (i32, i32, i32) {
    %c0_i32 = arith.constant 0 : i32
    %c0_i32_0 = arith.constant 0 : i32
    %c0_i32_1 = arith.constant 0 : i32
    return %arg0, %c0_i32, %c0_i32_0 : i32, i32, i32
  }
}

</mosaic_0001>

<bundles_post_ra>
// kernel: forward.1
= control target key start
LH: loop header
LB: loop body
LE: loop exit
PB: predicated region body
PF: predicated region fallthrough
CT: control target
= control target key end

     0   :  { %s2920_s0 = inlined_call_operand.vmem [shape: bf16[2,4,192], index: 0, kind: input, shape index: {}]   ;;  %s2921_s1 = inlined_call_operand.vmem [shape: bf16[192,32], index: 1, kind: input, shape index: {}]   ;;  %s2922_s2 = inlined_call_operand.vmem [shape: f32[5,32], index: 2, kind: input, shape index: {}]   ;;  %s2923_s3 = inlined_call_operand.vmem [shape: f32[2,6,32], index: 3, kind: input, shape index: {}]   ;;  %s2924_s4 = inlined_call_operand.vmem [shape: bf16[2,32,96], index: 4, kind: input, shape index: {}]   ;;  %s2925_s5 = inlined_call_operand.vmem [shape: f32[2,1,96], index: 5, kind: input, shape index: {}]   ;;  %s2926_s6 = inlined_call_operand.vmem [shape: bf16[2,32,32], index: 6, kind: input, shape index: {}]   ;;  %s2927_s7 = inlined_call_operand.vmem [shape: bf16[2,32,64], index: 7, kind: input, shape index: {}]   ;;  %s2928_s8 = inlined_call_operand.vmem [shape: f32[2,1,64], index: 8, kind: input, shape index: {}]   ;;  %s2929_s9 = inlined_call_operand.vmem [shape: bf16[2,64,32], index: 9, kind: input, shape index: {}]   ;;  %s2930_s10 = inlined_call_operand.vmem [shape: f32[2,32], index: 10, kind: input, shape index: {}]   ;;  %s2931_s11 = inlined_call_operand.hbm [shape: f32[2,4,32], index: 11, kind: output, shape index: {}]  }
   0x1   :  { %2935 = sst [smem:[#allocation6_spill]] %s2920_s0 }
   0x2   :  { %16 = vsyncpa [#allocation3], 0 }
   0x3   :  { %18 = vsyncpa [#allocation3 + $0x1], 0  ;;  %s2532_s17 = smov 0   ;;  %s2534_s18 = smov 0  }
   0x4   :  { %s2536_s19 = smov 0   ;;  %s2538_s20 = smov 0  }
   0x5 LB: > { %s2553_s21 = sadd.s32 4294967295, %s2460_s20   ;;  %s2016_s22 = sadd.s32 4294967294, %s2460_s20   ;;  %s2460_s20 = sphi %s2538_s20, %s2947_s20   ;;  %s2456_s19 = sphi %s2536_s19, %s2946_s19   ;;  %s2452_s18 = sphi %s2534_s18, %s2945_s18   ;;  %s2448_s17 = sphi %s2532_s17, %s2944_s17  }
   0x6   : > { %s2557_s23 = sadd.s32 1, %s2460_s20   ;;  %s267_s24 = sadd.s32 1, %s2456_s19 }
   0x7   : > { %s264_s25 = ssub.s32 %s2460_s20, %s2557_s23  ;;  %p277_p0 = scmp.ne.s32.totalorder %s2456_s19, %s2452_s18 }
   0x8   : > { %p265_p1 = scmp.eq.s32.totalorder %s264_s25, 0  ;;  %p278_p2 = scmp.eq.s32.totalorder %s2553_s21, 1 }
   0x9   : > { %p283_p3 = scmp.ne.s32.totalorder %s2452_s18, %s2448_s17  ;;  %p284_p4 = scmp.eq.s32.totalorder %s2016_s22, 1 }
   0xa   : > { %s2568_s26 = scalar_select %p265_p1, %s2456_s19, %s267_s24  }
   0xb   : > { %p2570_p5 = por %p278_p2, %p277_p0  ;;  %p2574_p6 = por %p284_p4, %p283_p3 }
   0xc   : > { %2936 = sst [smem:[#allocation5_spill]] %s2568_s26  ;;  %p2019_p7 = scmp.ge.s32.totalorder %s2460_s20, 1 }
   0xd   : > { %p340_p8 = scmp.lt.s32.totalorder %s2460_s20, 3 }
   0xf   : > { %p341_p9 = pnand %p2019_p7, %p340_p8 }
  0x10   : > { %v2336_v0 = vld [vmem:[%s2921_s1] sm:$0xff] (!%p341_p9)   ;;  %v2462_v1 = vmov (!%p341_p9), 0   ;;  %p380_p10 = scmp.lt.s32.totalorder (!%p341_p9), %s2553_s21, 1  ;;  %v2337_v2 = vld [vmem:[%s2921_s1 + $0x8] sm:$0xff] (!%p341_p9)   ;;  %v2338_v3 = vld [vmem:[%s2921_s1 + $0x10] sm:$0xff] (!%p341_p9)   ;;  %s2939_s0 = sld [smem:[#allocation6_spill]] (!%p341_p9) }
  0x11   : > { %344 = sbr.rel (%p341_p9) target bundleno = 6659 (0x1a03), region = 64  ;;  %499 = vmatprep.subr.bf16.mxu0 (!%p341_p9), %v2462_v1  ;;  %v2339_v4 = vld [vmem:[%s2921_s1 + $0x18] sm:$0xff] (!%p341_p9)   ;;  %v2340_v5 = vld [vmem:[%s2921_s1 + $0x20] sm:$0xff] (!%p341_p9)   ;;  %vm495_vm0 = vcmask (!%p341_p9), 523264   ;;  %v2341_v8 = vld [vmem:[%s2921_s1 + $0x28] sm:$0xff] (!%p341_p9)   ;;  %vm542_vm1 = vcmask (!%p341_p9), 1040384  }
  0x12   : > { %500 = vmatpush1.bf16.msra.mxu0 (!%p341_p9), %v2336_v0  ;;  %v2342_v9 = vld [vmem:[%s2921_s1 + $0x30] sm:$0xff] (!%p341_p9)   ;;  %v2343_v10 = vld [vmem:[%s2921_s1 + $0x38] sm:$0xff] (!%p341_p9)   ;;  %v2344_v11 = vld [vmem:[%s2921_s1 + $0x40] sm:$0xff] (!%p341_p9)   ;;  %vm546_vm2 = vcmask (!%p341_p9), 258048   ;;  %v2463_v31 = vmov (!%p341_p9), 0.0   ;;  %vm2464_vm3 = vmmov (!%p341_p9), 0  }
  0x13   : > { %501 = vmatprep.subr.bf16.mxu0 (!%p341_p9), %v2462_v1  ;;  %v2345_v12 = vld [vmem:[%s2921_s1 + $0x48] sm:$0xff] (!%p341_p9)   ;;  %v2346_v13 = vld [vmem:[%s2921_s1 + $0x50] sm:$0xff] (!%p341_p9)   ;;  %v2347_v14 = vld [vmem:[%s2921_s1 + $0x58] sm:$0xff] (!%p341_p9)   ;;  %2176 = vmatprep.subr.bf16.mxu1 (!%p341_p9), %v2463_v31  ;;  %vm595_vm4 = vcmask (!%p341_p9), 261120   ;;  %s2465_s25 = smov (!%p341_p9), 64   ;;  %s2934_s30 = smov (!%p341_p9), 80  }
  0x14   : > { %v412_v15 = vld [vmem:[%s2922_s2 + $0x1] sm:$0xf] (!%p341_p9)  ;;  %v411_v20 = vld [vmem:[%s2922_s2] sm:$0x1] (!%p341_p9)  ;;  %2180 = vmatprep.mubr.msk.bf16.mxu1 (!%p341_p9), %vm2464_vm3, %v2463_v31  ;;  %v2349_v32 = vld [vmem:[%s2924_s4 + $0x8] sm:$0xff] (!%p341_p9)   ;;  %vm642_vm5 = vcmask (!%p341_p9), 130048  }
  0x15   : > { %v2348_v30 = vld [vmem:[%s2924_s4] sm:$0xff] (!%p341_p9)   ;;  %vm736_vm6 = vcmask (!%p341_p9), 1044480   ;;  %vm718_vm7 = vcmask (!%p341_p9), 36864   ;;  %s2468_s12 = smov (!%p341_p9), 112   ;;  %vm732_vm8 = vcmask (!%p341_p9), 39936   ;;  %s2933_s13 = smov (!%p341_p9), 48  }
  0x16   : > { %502 = vmatpush1.bf16.msra.mxu0 (!%p341_p9), %v2337_v2  ;;  %2177 = vmatpush3.bf16.msra.mxu1 (!%p341_p9), %v2348_v30  ;;  %v2037_v37 = vld [vmem:[%s2923_s3] ss:$0 sm:$0xff] (!%p341_p9)  ;;  %v2038_v39 = vld [vmem:[%s2923_s3 + $0x1] ss:$0 sm:$0xff] (!%p341_p9)  ;;  %s2942_s24 = smov (!%p341_p9), 16   ;;  %vm1941_vm9 = vcmask (!%p341_p9), 258049  }
  0x17   : > { %503 = vmatprep.subr.bf16.mxu0 (!%p341_p9), %v2462_v1  ;;  %2178 = vmatprep.subr.bf16.mxu1 (!%p341_p9), %v2463_v31  ;;  %v2039_v43 = vld [vmem:[%s2925_s5] ss:$0 sm:$0xff] (!%p341_p9) }
  0x18   : > { %s381_s14 = scalar_select %p380_p10, %s2553_s21, 1 }
  0x1a   : > { %s2131_s22 = sshll.u32 %s381_s14, 2  ;;  %504 = vmatpush1.bf16.msra.mxu0 %v2338_v3  ;;  %2179 = vmatpush3.bf16.msra.mxu1 %v2349_v32 }
  0x1b   : > { %s384_s29 = scalar_lea.vmem %s2939_s0, %s2131_s22  ;;  %505 = vmatprep.subr.bf16.mxu0 %v2462_v1  ;;  %2184 = vmatprep.subr.mxu1 %v2463_v31  ;;  %s2932_s22 = smov 16  }
  0x1c   : > { %v2023_v6 = vld.sshfl [vmem:[%s384_s29] sm:$0x33 pattern:$0x76325410]  ;;  %s2466_s29 = smov 96  }
  0x1d   : > { %v421_v7 = vcombine.high %v2023_v6, %v2023_v6 }
  0x1e   : > { %506 = vmatpush1.bf16.msra.mxu0 %v2339_v4 }
  0x1f   : > { %507 = vmatprep.subr.bf16.mxu0 %v2462_v1  ;;  %2036 = vmatprep.mubr.msk.bf16.mxu0 %vm495_vm0, %v421_v7 }
  0x22   : > { %508 = vmatpush1.bf16.msra.mxu0 %v2340_v5 }
  0x23   : > { %509 = vmatprep.subr.bf16.mxu0 %v2462_v1 }
  0x26   : > { %510 = vmatpush1.bf16.msra.mxu0 %v2341_v8 }
  0x27   : > { %511 = vmatprep.subr.bf16.mxu0 %v2462_v1 }
  0x2a   : > { %512 = vmatpush1.bf16.msra.mxu0 %v2342_v9 }
  0x2b   : > { %513 = vmatprep.subr.bf16.mxu0 %v2462_v1 }
  0x2e   : > { %514 = vmatpush1.bf16.msra.mxu0 %v2343_v10 }
  0x2f   : > { %515 = vmatprep.subr.bf16.mxu0 %v2462_v1 }
  0x32   : > { %516 = vmatpush1.bf16.msra.mxu0 %v2344_v11 }
  0x33   : > { %517 = vmatprep.subr.bf16.mxu0 %v2462_v1 }
  0x36   : > { %518 = vmatpush1.bf16.msra.mxu0 %v2345_v12 }
  0x37   : > { %519 = vmatprep.subr.bf16.mxu0 %v2462_v1 }
  0x3a   : > { %520 = vmatpush1.bf16.msra.mxu0 %v2346_v13 }
  0x3b   : > { %521 = vmatprep.subr.bf16.mxu0 %v2462_v1 }
  0x3e   : > { %522 = vmatpush1.bf16.msra.mxu0 %v2347_v14 }
  0x3f   : > { %2232 = vmatprep.subr.bf16.mxu0 %v2463_v31 }
  0x41   : > { %532 = vmatmul.mubr.bf16.vlgmr.msra.gmra.mrb[0].mxu0 %v2023_v6 }
  0x42   : > { %2236 = vmatprep.mubr.msk.bf16.mxu0 %vm2464_vm3, %v2463_v31 }
 0x114   : > { %v533_v16 = vpop.f32.mrb[0].mxu0 }
 0x115   : > { %v534_v17 = vadd.f32 %v533_v16, %v412_v15  ;;  %v535_v18 = vpop.f32.mrb[1].mxu0  ;;  %v2350_v16 = vld [vmem:[%s2926_s6] sm:$0xff]  }
 0x116   : > { %v536_v19 = vpop.f32.mrb[2].mxu0 }
 0x117   : > { %v540_v21 = vrot.slane %v534_v17, 7  ;;  %v537_v22 = vpop.f32.mrb[3].mxu0  ;;  %v2351_v17 = vld [vmem:[%s2926_s6 + $0x8] sm:$0xff]  }
 0x119   : > { %v2628_v23 = vsel %vm542_vm1, %v411_v20, %v540_v21 }
 0x11a   : > { %v547_v24 = vsel %vm546_vm2, %v2628_v23, 0.0 }
 0x11b   : > { %548 = vadd.xlane.f32.xlu0 %v547_v24  ;;  %v2051_v24 = vld [vmem:[%s2923_s3 + $0x4] ss:$0 sm:$0xff] }
 0x1a8   : > { %v549_v25 = vpop.xlane.xlu0 %548 }
 0x1a9   : > { %v551_v26 = vmul.f32 0.03125, %v549_v25 }
 0x1ab   : > { %v552_v27 = vsub.f32 %v2628_v23, %v551_v26 }
 0x1ad   : > { %v553_v28 = vmul.f32 %v552_v27, %v552_v27 }
 0x1af   : > { %v554_v29 = vsel %vm546_vm2, %v553_v28, 0.0 }
 0x1b0   : > { %555 = vadd.xlane.f32.xlu0 %v554_v29 }
 0x23d   : > { %v556_v33 = vpop.xlane.xlu0 %555 }
 0x23e   : > { %v557_v34 = vmul.f32 0.03125, %v556_v33 }
 0x240   : > { %v558_v35 = vadd.f32 1e-12, %v557_v34 }
 0x242   : > { %2368 = vrsqrt.f32 %v558_v35 }
 0x24c   : > { %v2369_v36 = vpop.eup %2368 }
 0x24d   : > { %v560_v38 = vmul.f32 %v2369_v36, %v552_v27 }
 0x24f   : > { %v565_v40 = vmul.f32 %v2037_v37, %v560_v38  ;;  %v2352_v38 = vld [vmem:[%s2927_s7] sm:$0xff]  }
 0x251   : > { %v570_v41 = vadd.f32 %v2038_v39, %v565_v40 }
 0x253   : > { %v571_v42 = vpack.c.bf16 %v570_v41, %v570_v41 }
 0x255   : > { %2181 = vmatmul.mubr.msk.bf16.vlgmr.msra.gmra.mrb[0].mxu1 %vm595_vm4, %v571_v42 }
 0x256   : > { %2186 = vmatprep.mubr.msk.f32.mxu1 %vm2464_vm3, %v2463_v31 }
 0x328   : > { %v633_v44 = vpop.f32.mrb[0].mxu1 }
 0x329   : > { %v634_v45 = vadd.f32 %v2039_v43, %v633_v44  ;;  %v2182_v46 = vpop.f32.mrb[1].mxu1  ;;  %v2055_v43 = vld [vmem:[%s2923_s3 + $0x2] ss:$0 sm:$0xff] }
 0x32a   : > { %v636_v47 = vpop.f32.mrb[2].mxu1 }
 0x32b   : > { %730 = vrot.lane.b32.xlu0 %v634_v45, %s2465_s25  ;;  %640 = vrot.lane.b32.xlu1 %v634_v45, %s2466_s29  ;;  %v2183_v48 = vpop.f32.mrb[3].mxu1 }
 0x32f   : > { %811 = vrot.lane.b32.xlu0 %v634_v45, %s2934_s30  ;;  %s377_s30 = sand.u32 1, %s2452_s18  }
 0x39d   : > { %v641_v49 = vpop.permute.xlu1 %640  ;;  %v731_v50 = vpop.permute.xlu0 %730 }
 0x39e   : > { %2185 = vmatpush3.xpose.msk.msra.mxu1 %vm642_vm5, %v641_v49  ;;  %v2354_v49 = vld [vmem:[%s2929_s9] sm:$0xff]  }
 0x39f   : > { %2189 = vmatprep.subr.mxu1 %v2463_v31 }
 0x3a1   : > { %2187 = vmatmul.mubr.msk.f32.vlgmr.msra.gmra.mrb[4].mxu1 %vm642_vm5, %v634_v45  ;;  %v812_v60 = vpop.permute.xlu0 %811 }
 0x3a2   : > { %2190 = vmatpush3.msk.msra.mxu1 %vm736_vm6, %v731_v50  ;;  %2191 = vmatprep.mubr.msk.f32.mxu1 %vm2464_vm3, %v2463_v31  ;;  %v2355_v50 = vld [vmem:[%s2929_s9 + $0x8] sm:$0xff]  }
 0x3a3   : > { %2194 = vmatprep.subr.mxu1 %v2463_v31 }
 0x474   : > { %v713_v51 = vpop.f32.mrb[4].mxu1 }
 0x475   : > { %v717_v52 = vmul.f32 0.25, %v713_v51  ;;  %v2188_v53 = vpop.f32.mrb[5].mxu1  ;;  %v2356_v51 = vld [vmem:[%s2929_s9 + $0x10] sm:$0xff]  }
 0x476   : > { %v2057_v53 = vld [vmem:[%s2928_s8] ss:$0 sm:$0xff] }
 0x477   : > { %v719_v54 = vsel %vm718_vm7, %v717_v52, -inf }
 0x478   : > { %720 = vmax.xlane.f32.xlu1 %v719_v54 }
 0x505   : > { %v721_v55 = vpop.xlane.xlu1 %720 }
 0x506   : > { %v722_v56 = vsub.f32 %v717_v52, %v721_v55  ;;  %v2357_v52 = vld [vmem:[%s2929_s9 + $0x18] sm:$0xff]  }
 0x508   : > { %v723_v57 = vmul.f32 1.442695, %v722_v56 }
 0x50a   : > { %2370 = vpow2.f32 %v723_v57 }
 0x514   : > { %v2371_v58 = vpop.eup %2370 }
 0x515   : > { %v725_v59 = vsel %vm718_vm7, %v2371_v58, 0.0 }
 0x516   : > { %726 = vadd.xlane.f32.xlu0 %v725_v59 }
 0x52c   : > { %809 = vrot.lane.b32.xlu0 %v634_v45, %s2468_s12 }
 0x5a3   : > { %v727_v61 = vpop.xlane.xlu0 %726 }
 0x5a4   : > { %2372 = vrcp.f32 %v727_v61 }
 0x5a7   : > { %v810_v0 = vpop.permute.xlu0 %809 }
 0x5ae   : > { %v2373_v62 = vpop.eup %2372 }
 0x5af   : > { %v729_v63 = vmul.f32 %v2373_v62, %v2371_v58 }
 0x5b1   : > { %2192 = vmatmul.mubr.msk.f32.vlgmr.msra.gmra.mrb[6].mxu1 %vm732_vm8, %v729_v63 }
 0x5b2   : > { %2195 = vmatpush3.xpose.msk.msra.mxu1 %vm642_vm5, %v812_v60  ;;  %2196 = vmatprep.mubr.msk.f32.mxu1 %vm2464_vm3, %v2463_v31 }
 0x5b3   : > { %2199 = vmatprep.subr.mxu1 %v2463_v31 }
 0x5b5   : > { %2197 = vmatmul.mubr.msk.f32.vlgmr.msra.gmra.mrb[8].mxu1 %vm642_vm5, %v810_v0 }
 0x5b6   : > { %2201 = vmatprep.mubr.msk.f32.mxu1 %vm2464_vm3, %v2463_v31 }
 0x684   : > { %v805_v1 = vpop.f32.mrb[6].mxu1 }
 0x685   : > { %v2193_v2 = vpop.f32.mrb[7].mxu1 }
 0x688   : > { %v883_v3 = vpop.f32.mrb[8].mxu1 }
 0x689   : > { %v887_v4 = vmul.f32 0.25, %v883_v3  ;;  %v2198_v5 = vpop.f32.mrb[9].mxu1 }
 0x68a   : > { %v2061_v5 = vld [vmem:[%s2923_s3 + $0x5] ss:$0 sm:$0xff] }
 0x68b   : > { %v888_v6 = vsel %vm718_vm7, %v887_v4, -inf }
 0x68c   : > { %889 = vmax.xlane.f32.xlu1 %v888_v6 }
 0x69d   : > { %899 = vrot.lane.b32.xlu1 %v634_v45, %s2933_s13  ;;  %v2056_v45 = vld [vmem:[%s2923_s3 + $0x3] ss:$0 sm:$0xff]  ;;  %s2020_s13 = sshll.u32 %s377_s30, 2 }
 0x69e   : > { %s379_s15 = scalar_lea.vmem [#allocation2], %s2020_s13 }
 0x69f   : > { %s1957_s26 = sshll.u32 %s379_s15, 4  ;;  %s2880_s26 = int_to_ptr.vmem [resolvable:$true] %s1957_s26 }
 0x6a0   : > { %s2398_s14 = scalar_lea.vmem %s2880_s26, 64 }
 0x6a1   : > { %p2399_p11 = scmp.ne.s32.totalorder %s2880_s26, %s2398_s14 }
 0x6a3   : > { %p2400_p12 = pnand %p2399_p11, %p2570_p5 }
 0x6a5   : > { %p2401_p13 = pneg %p2400_p12 }
 0x719   : > { %v890_v7 = vpop.xlane.xlu1 %889 }
 0x71a   : > { %v891_v8 = vsub.f32 %v887_v4, %v890_v7 }
 0x71c   : > { %v892_v9 = vmul.f32 1.442695, %v891_v8 }
 0x71d   : > { %v900_v10 = vpop.permute.xlu1 %899 }
 0x71e   : > { %2374 = vpow2.f32 %v892_v9  ;;  %2200 = vmatpush3.msk.msra.mxu1 %vm736_vm6, %v900_v10 }
 0x71f   : > { %2204 = vmatprep.subr.bf16.mxu1 %v2463_v31 }
 0x728   : > { %v2375_v11 = vpop.eup %2374 }
 0x729   : > { %v894_v12 = vsel %vm718_vm7, %v2375_v11, 0.0 }
 0x72a   : > { %895 = vadd.xlane.f32.xlu0 %v894_v12 }
 0x7b7   : > { %v896_v13 = vpop.xlane.xlu0 %895 }
 0x7b8   : > { %2376 = vrcp.f32 %v896_v13 }
 0x7c2   : > { %v2377_v14 = vpop.eup %2376 }
 0x7c3   : > { %v898_v15 = vmul.f32 %v2377_v14, %v2375_v11 }
 0x7c5   : > { %2202 = vmatmul.mubr.msk.f32.vlgmr.msra.gmra.mrb[10].mxu1 %vm732_vm8, %v898_v15 }
 0x7c6   : > { %2208 = vmatprep.mubr.msk.bf16.mxu1 %vm2464_vm3, %v2463_v31  ;;  %2205 = vmatpush3.bf16.msra.mxu1 %v2350_v16 }
 0x7c7   : > { %2206 = vmatprep.subr.bf16.mxu1 %v2463_v31 }
 0x7ca   : > { %2207 = vmatpush3.bf16.msra.mxu1 %v2351_v17 }
 0x7cb   : > { %2212 = vmatprep.subr.bf16.mxu1 %v2463_v31 }
 0x898   : > { %v972_v18 = vpop.f32.mrb[10].mxu1 }
 0x899   : > { %977 = vrot.lane.b32.xlu1 %v972_v18, %s2932_s22  ;;  %v2203_v19 = vpop.f32.mrb[11].mxu1  ;;  %v2358_v18 = vld [vmem:[%s2924_s4 + $0x10] sm:$0xff]   ;;  %s1944_s22 = scalar_lea.sflag [#allocation3], %s377_s30 }
 0x89a   : > { %2233 = vmatpush3.bf16.msra.mxu0 %v2358_v18  ;;  %v2359_v19 = vld [vmem:[%s2924_s4 + $0x18] sm:$0xff]  }
 0x89b   : > { %2234 = vmatprep.subr.bf16.mxu0 %v2463_v31 }
 0x89e   : > { %2235 = vmatpush3.bf16.msra.mxu0 %v2359_v19 }
 0x89f   : > { %2240 = vmatprep.subr.mxu0 %v2463_v31 }
 0x90b   : > { %v978_v20 = vpop.permute.xlu1 %977 }
 0x90c   : > { %v980_v21 = vsel %vm642_vm5, %v805_v1, %v978_v20 }
 0x90d   : > { %v981_v22 = vpack.c.bf16 %v980_v21, %v980_v21 }
 0x90f   : > { %2209 = vmatmul.mubr.msk.bf16.vlgmr.msra.gmra.mrb[12].mxu1 %vm595_vm4, %v981_v22 }
 0x910   : > { %2216 = vmatprep.mubr.msk.bf16.mxu1 %vm2464_vm3, %v2463_v31  ;;  %2213 = vmatpush3.bf16.msra.mxu1 %v2352_v38 }
 0x911   : > { %2214 = vmatprep.subr.bf16.mxu1 %v2463_v31 }
 0x9e2   : > { %v1040_v25 = vpop.f32.mrb[12].mxu1 }
 0x9e3   : > { %v1041_v26 = vadd.f32 %v2051_v24, %v1040_v25  ;;  %v2210_v27 = vpop.f32.mrb[13].mxu1  ;;  %v2069_v25 = vld [vmem:[%s2923_s3 + $0x8] ss:$0 sm:$0xff] }
 0x9e4   : > { %v1043_v28 = vpop.f32.mrb[14].mxu1  ;;  %v2070_v27 = vld [vmem:[%s2923_s3 + $0x9] ss:$0 sm:$0xff] }
 0x9e5   : > { %v2706_v29 = vadd.f32 %v1041_v26, %v2628_v23  ;;  %v2211_v30 = vpop.f32.mrb[15].mxu1  ;;  %v2353_v23 = vld [vmem:[%s2927_s7 + $0x8] sm:$0xff]  }
 0x9e6   : > { %2215 = vmatpush3.bf16.msra.mxu1 %v2353_v23 }
 0x9e7   : > { %v1049_v32 = vsel %vm546_vm2, %v2706_v29, 0.0  ;;  %2220 = vmatprep.subr.bf16.mxu1 %v2463_v31 }
 0x9e8   : > { %1050 = vadd.xlane.f32.xlu1 %v1049_v32  ;;  %v2076_v32 = vld [vmem:[%s2925_s5 + $0x1] ss:$0 sm:$0xff] }
 0xa75   : > { %v1051_v33 = vpop.xlane.xlu1 %1050 }
 0xa76   : > { %v1052_v34 = vmul.f32 0.03125, %v1051_v33 }
 0xa78   : > { %v1053_v35 = vsub.f32 %v2706_v29, %v1052_v34 }
 0xa7a   : > { %v1054_v36 = vmul.f32 %v1053_v35, %v1053_v35 }
 0xa7c   : > { %v1055_v37 = vsel %vm546_vm2, %v1054_v36, 0.0 }
 0xa7d   : > { %1056 = vadd.xlane.f32.xlu0 %v1055_v37 }
 0xb0a   : > { %v1057_v39 = vpop.xlane.xlu0 %1056 }
 0xb0b   : > { %v1058_v40 = vmul.f32 0.03125, %v1057_v39 }
 0xb0d   : > { %v1059_v41 = vadd.f32 1e-12, %v1058_v40 }
 0xb0f   : > { %2378 = vrsqrt.f32 %v1059_v41 }
 0xb19   : > { %v2379_v42 = vpop.eup %2378 }
 0xb1a   : > { %v1061_v44 = vmul.f32 %v2379_v42, %v1053_v35 }
 0xb1c   : > { %v1066_v46 = vmul.f32 %v2055_v43, %v1061_v44 }
 0xb1e   : > { %v1071_v47 = vadd.f32 %v2056_v45, %v1066_v46 }
 0xb20   : > { %v1072_v48 = vpack.c.bf16 %v1071_v47, %v1071_v47 }
 0xb22   : > { %2217 = vmatmul.mubr.msk.bf16.vlgmr.msra.gmra.mrb[16].mxu1 %vm595_vm4, %v1072_v48 }
 0xb23   : > { %2228 = vmatprep.mubr.msk.bf16.mxu1 %vm2464_vm3, %v2463_v31  ;;  %2221 = vmatpush3.bf16.msra.mxu1 %v2354_v49 }
 0xb24   : > { %2222 = vmatprep.subr.bf16.mxu1 %v2463_v31 }
 0xb27   : > { %2223 = vmatpush3.bf16.msra.mxu1 %v2355_v50 }
 0xb28   : > { %2224 = vmatprep.subr.bf16.mxu1 %v2463_v31 }
 0xb2b   : > { %2225 = vmatpush3.bf16.msra.mxu1 %v2356_v51 }
 0xb2c   : > { %2226 = vmatprep.subr.bf16.mxu1 %v2463_v31 }
 0xb2f   : > { %2227 = vmatpush3.bf16.msra.mxu1 %v2357_v52 }
 0xb30   : > { %2260 = vmatprep.subr.bf16.mxu1 %v2463_v31 }
 0xbf5   : > { %v1133_v54 = vpop.f32.mrb[16].mxu1 }
 0xbf6   : > { %v1134_v55 = vadd.f32 %v2057_v53, %v1133_v54  ;;  %v2218_v56 = vpop.f32.mrb[17].mxu1 }
 0xbf7   : > { %v1136_v57 = vpop.f32.mrb[18].mxu1 }
 0xbf8   : > { %v1140_v58 = vmul.f32 0.044715, %v1134_v55  ;;  %v2219_v59 = vpop.f32.mrb[19].mxu1  ;;  %v1139_v1 = vmul.f32 0.5, %v1134_v55 }
 0xbfa   : > { %v1141_v60 = vmul.f32 %v1140_v58, %v1134_v55 }
 0xbfc   : > { %v1142_v61 = vmul.f32 %v1141_v60, %v1134_v55 }
 0xbfe   : > { %v1143_v62 = vadd.f32 %v1142_v61, %v1134_v55 }
 0xc00   : > { %v1144_v63 = vmul.f32 0.7978846, %v1143_v62 }
 0xc02   : > { %2380 = vtanh.f32 %v1144_v63 }
 0xc0c   : > { %v2381_v0 = vpop.eup %2380 }
 0xc0d   : > { %v1146_v2 = vadd.f32 1.0, %v2381_v0 }
 0xc0f   : > { %v1147_v3 = vmul.f32 %v1146_v2, %v1139_v1 }
 0xc11   : > { %v1148_v4 = vpack.c.bf16 %v1147_v3, %v1147_v3 }
 0xc13   : > { %2229 = vmatmul.mubr.msk.bf16.vlgmr.msra.gmra.mrb[20].mxu1 %vm495_vm0, %v1148_v4  ;;  %v2360_v4 = vld [vmem:[%s2926_s6 + $0x10] sm:$0xff]  }
 0xc14   : > { %2264 = vmatprep.mubr.msk.bf16.mxu1 %vm2464_vm3, %v2463_v31  ;;  %2261 = vmatpush3.bf16.msra.mxu1 %v2360_v4 }
 0xc15   : > { %2262 = vmatprep.subr.bf16.mxu1 %v2463_v31 }
 0xce6   : > { %v1223_v6 = vpop.f32.mrb[20].mxu1 }
 0xce7   : > { %v1224_v7 = vadd.f32 %v2061_v5, %v1223_v6  ;;  %v2230_v8 = vpop.f32.mrb[21].mxu1  ;;  %v2361_v5 = vld [vmem:[%s2926_s6 + $0x18] sm:$0xff]  }
 0xce8   : > { %v1226_v9 = vpop.f32.mrb[22].mxu1  ;;  %2263 = vmatpush3.bf16.msra.mxu1 %v2361_v5 }
 0xce9   : > { %v2755_v10 = vadd.f32 %v1224_v7, %v2706_v29  ;;  %v2231_v11 = vpop.f32.mrb[23].mxu1  ;;  %2276 = vmatprep.subr.bf16.mxu1 %v2463_v31 }
 0xceb   : > { %v1233_v12 = vsel %vm546_vm2, %v2755_v10, 0.0 }
 0xcec   : > { %1234 = vadd.xlane.f32.xlu0 %v1233_v12  ;;  %v2093_v12 = vld [vmem:[%s2923_s3 + $0xc] ss:$0 sm:$0xff] }
 0xd79   : > { %v1235_v13 = vpop.xlane.xlu0 %1234 }
 0xd7a   : > { %v1236_v14 = vmul.f32 0.03125, %v1235_v13 }
 0xd7c   : > { %v1237_v15 = vsub.f32 %v2755_v10, %v1236_v14 }
 0xd7e   : > { %v1238_v16 = vmul.f32 %v1237_v15, %v1237_v15 }
 0xd80   : > { %v1239_v17 = vsel %vm546_vm2, %v1238_v16, 0.0 }
 0xd81   : > { %1240 = vadd.xlane.f32.xlu0 %v1239_v17 }
 0xe0e   : > { %v1241_v20 = vpop.xlane.xlu0 %1240 }
 0xe0f   : > { %v1242_v21 = vmul.f32 0.03125, %v1241_v20 }
 0xe11   : > { %v1243_v22 = vadd.f32 1e-12, %v1242_v21 }
 0xe13   : > { %2382 = vrsqrt.f32 %v1243_v22 }
 0xe1d   : > { %v2383_v24 = vpop.eup %2382 }
 0xe1e   : > { %v1245_v26 = vmul.f32 %v2383_v24, %v1237_v15 }
 0xe20   : > { %v1250_v28 = vmul.f32 %v2069_v25, %v1245_v26  ;;  %v2362_v26 = vld [vmem:[%s2927_s7 + $0x10] sm:$0xff]  }
 0xe22   : > { %v1255_v29 = vadd.f32 %v2070_v27, %v1250_v28 }
 0xe24   : > { %v1256_v30 = vpack.c.bf16 %v1255_v29, %v1255_v29 }
 0xe26   : > { %2237 = vmatmul.mubr.msk.bf16.vlgmr.msra.gmra.mrb[4].mxu0 %vm595_vm4, %v1256_v30 }
 0xe27   : > { %2242 = vmatprep.mubr.msk.f32.mxu0 %vm2464_vm3, %v2463_v31 }
 0xef9   : > { %v1319_v33 = vpop.f32.mrb[4].mxu0 }
 0xefa   : > { %v1320_v34 = vadd.f32 %v2076_v32, %v1319_v33  ;;  %v2238_v35 = vpop.f32.mrb[5].mxu0  ;;  %v2099_v32 = vld [vmem:[%s2923_s3 + $0xa] ss:$0 sm:$0xff] }
 0xefb   : > { %v1322_v36 = vpop.f32.mrb[6].mxu0 }
 0xefc   : > { %1326 = vrot.lane.b32.xlu0 %v1320_v34, %s2466_s29  ;;  %v2239_v37 = vpop.f32.mrb[7].mxu0  ;;  %s2941_s29 = smov 48  }
 0xf00   : > { %1414 = vrot.lane.b32.xlu0 %v1320_v34, %s2465_s25  ;;  %s2940_s25 = smov 80  }
 0xf04   : > { %1491 = vrot.lane.b32.xlu0 %v1320_v34, %s2468_s12  ;;  %s2128_s12 = sshll.u32 %s2553_s21, 6  ;;  %s2471_s21 = smov [#allocation2]  }
 0xf05   : > { %s2878_s0 = scalar_lea.hbm %s2931_s11, %s2128_s12  ;;  %s2402_s13 = sshll.u32 %s2471_s21, 4  ;;  %s2403_s13 = int_to_ptr.vmem [resolvable:$false] %s2402_s13 }
 0xf06   : > { %p2405_p0 = scmp.lt.s32.totalorder %s2880_s26, %s2403_s13 }
 0xf6e   : > { %v1327_v38 = vpop.permute.xlu0 %1326 }
 0xf6f   : > { %2241 = vmatpush3.xpose.msk.msra.mxu0 %vm642_vm5, %v1327_v38  ;;  %v2364_v38 = vld [vmem:[%s2929_s9 + $0x20] sm:$0xff]  }
 0xf70   : > { %2245 = vmatprep.subr.mxu0 %v2463_v31 }
 0xf72   : > { %2243 = vmatmul.mubr.msk.f32.vlgmr.msra.gmra.mrb[8].mxu0 %vm642_vm5, %v1320_v34  ;;  %v1415_v23 = vpop.permute.xlu0 %1414 }
 0xf73   : > { %2246 = vmatpush3.msk.msra.mxu0 %vm736_vm6, %v1415_v23  ;;  %2247 = vmatprep.mubr.msk.f32.mxu0 %vm2464_vm3, %v2463_v31  ;;  %v2365_v23 = vld [vmem:[%s2929_s9 + $0x28] sm:$0xff]  }
 0xf74   : > { %2250 = vmatprep.subr.mxu0 %v2463_v31 }
 0xf76   : > { %v1492_v52 = vpop.permute.xlu0 %1491 }
0x1045   : > { %v1398_v39 = vpop.f32.mrb[8].mxu0 }
0x1046   : > { %v1402_v40 = vmul.f32 0.25, %v1398_v39  ;;  %v2244_v41 = vpop.f32.mrb[9].mxu0  ;;  %v2366_v39 = vld [vmem:[%s2929_s9 + $0x30] sm:$0xff]  }
0x1047   : > { %v2106_v41 = vld [vmem:[%s2928_s8 + $0x1] ss:$0 sm:$0xff] }
0x1048   : > { %v1403_v42 = vsel %vm718_vm7, %v1402_v40, -inf }
0x1049   : > { %1404 = vmax.xlane.f32.xlu1 %v1403_v42 }
0x10d6   : > { %v1405_v43 = vpop.xlane.xlu1 %1404 }
0x10d7   : > { %v1406_v44 = vsub.f32 %v1402_v40, %v1405_v43  ;;  %v2367_v40 = vld [vmem:[%s2929_s9 + $0x38] sm:$0xff]  }
0x10d9   : > { %v1407_v45 = vmul.f32 1.442695, %v1406_v44 }
0x10db   : > { %2384 = vpow2.f32 %v1407_v45 }
0x10e5   : > { %v2385_v46 = vpop.eup %2384 }
0x10e6   : > { %v1409_v47 = vsel %vm718_vm7, %v2385_v46, 0.0 }
0x10e7   : > { %1410 = vadd.xlane.f32.xlu1 %v1409_v47 }
0x10f8   : > { %1493 = vrot.lane.b32.xlu1 %v1320_v34, %s2940_s25  ;;  %s2404_s25 = scalar_lea.vmem %s2403_s13, 128 }
0x10f9   : > { %p2406_p1 = scmp.lt.s32.totalorder %s2404_s25, %s2398_s14 }
0x10fb   : > { %p2407_p2 = por %p2406_p1, %p2405_p0 }
0x10fd   : > { %p2408_p3 = pnand %p2407_p2, %p2401_p13 }
0x1174   : > { %v1411_v48 = vpop.xlane.xlu1 %1410 }
0x1175   : > { %2386 = vrcp.f32 %v1411_v48 }
0x1178   : > { %v1494_v51 = vpop.permute.xlu1 %1493 }
0x117f   : > { %v2387_v49 = vpop.eup %2386 }
0x1180   : > { %v1413_v50 = vmul.f32 %v2387_v49, %v2385_v46 }
0x1182   : > { %2248 = vmatmul.mubr.msk.f32.vlgmr.msra.gmra.mrb[10].mxu0 %vm732_vm8, %v1413_v50 }
0x1183   : > { %2251 = vmatpush3.xpose.msk.msra.mxu0 %vm642_vm5, %v1494_v51  ;;  %2252 = vmatprep.mubr.msk.f32.mxu0 %vm2464_vm3, %v2463_v31 }
0x1184   : > { %2255 = vmatprep.subr.mxu0 %v2463_v31 }
0x1186   : > { %2253 = vmatmul.mubr.msk.f32.vlgmr.msra.gmra.mrb[12].mxu0 %vm642_vm5, %v1492_v52 }
0x1187   : > { %2257 = vmatprep.mubr.msk.f32.mxu0 %vm2464_vm3, %v2463_v31 }
0x1255   : > { %v1487_v53 = vpop.f32.mrb[10].mxu0 }
0x1256   : > { %v2249_v54 = vpop.f32.mrb[11].mxu0 }
0x1259   : > { %v1565_v55 = vpop.f32.mrb[12].mxu0 }
0x125a   : > { %v1569_v56 = vmul.f32 0.25, %v1565_v55  ;;  %v2254_v57 = vpop.f32.mrb[13].mxu0 }
0x125c   : > { %v1570_v58 = vsel %vm718_vm7, %v1569_v56, -inf }
0x125d   : > { %1571 = vmax.xlane.f32.xlu0 %v1570_v58 }
0x1273   : > { %1581 = vrot.lane.b32.xlu0 %v1320_v34, %s2941_s29  ;;  %v2100_v34 = vld [vmem:[%s2923_s3 + $0xb] ss:$0 sm:$0xff] }
0x12ea   : > { %v1572_v59 = vpop.xlane.xlu0 %1571 }
0x12eb   : > { %v1573_v60 = vsub.f32 %v1569_v56, %v1572_v59  ;;  %v2119_v56 = vld [vmem:[%s2923_s3 + $0xd] ss:$0 sm:$0xff] }
0x12ed   : > { %v1574_v61 = vmul.f32 1.442695, %v1573_v60 }
0x12ee   : > { %v1582_v62 = vpop.permute.xlu0 %1581 }
0x12ef   : > { %2388 = vpow2.f32 %v1574_v61  ;;  %2256 = vmatpush3.msk.msra.mxu0 %vm736_vm6, %v1582_v62 }
0x12f0   : > { %2268 = vmatprep.subr.bf16.mxu0 %v2463_v31 }
0x12f9   : > { %v2389_v63 = vpop.eup %2388 }
0x12fa   : > { %v1576_v0 = vsel %vm718_vm7, %v2389_v63, 0.0 }
0x12fb   : > { %1577 = vadd.xlane.f32.xlu1 %v1576_v0 }
0x1388   : > { %v1578_v1 = vpop.xlane.xlu1 %1577 }
0x1389   : > { %2390 = vrcp.f32 %v1578_v1 }
0x1393   : > { %v2391_v2 = vpop.eup %2390 }
0x1394   : > { %v1580_v3 = vmul.f32 %v2391_v2, %v2389_v63 }
0x1396   : > { %2258 = vmatmul.mubr.msk.f32.vlgmr.msra.gmra.mrb[14].mxu0 %vm732_vm8, %v1580_v3 }
0x1397   : > { %2272 = vmatprep.mubr.msk.bf16.mxu0 %vm2464_vm3, %v2463_v31  ;;  %2269 = vmatpush3.bf16.msra.mxu0 %v2362_v26 }
0x1398   : > { %2270 = vmatprep.subr.bf16.mxu0 %v2463_v31 }
0x1469   : > { %v1654_v6 = vpop.f32.mrb[14].mxu0 }
0x146a   : > { %1659 = vrot.lane.b32.xlu1 %v1654_v6, %s2942_s24  ;;  %v2259_v7 = vpop.f32.mrb[15].mxu0 }
0x14dc   : > { %v1660_v8 = vpop.permute.xlu1 %1659 }
0x14dd   : > { %v1662_v9 = vsel %vm642_vm5, %v1487_v53, %v1660_v8 }
0x14de   : > { %v1663_v11 = vpack.c.bf16 %v1662_v9, %v1662_v9  ;;  %v2125_v9 = vld [vmem:[%s2930_s10] ss:$0 sm:$0xff] }
0x14e0   : > { %2265 = vmatmul.mubr.msk.bf16.vlgmr.msra.gmra.mrb[24].mxu1 %vm595_vm4, %v1663_v11 }
0x14e1   : > { %2284 = vmatprep.mubr.msk.bf16.mxu1 %vm2464_vm3, %v2463_v31  ;;  %2277 = vmatpush3.bf16.msra.mxu1 %v2364_v38 }
0x14e2   : > { %2278 = vmatprep.subr.bf16.mxu1 %v2463_v31 }
0x14e5   : > { %2279 = vmatpush3.bf16.msra.mxu1 %v2365_v23 }
0x14e6   : > { %2280 = vmatprep.subr.bf16.mxu1 %v2463_v31 }
0x14e9   : > { %2281 = vmatpush3.bf16.msra.mxu1 %v2366_v39 }
0x14ea   : > { %2282 = vmatprep.subr.bf16.mxu1 %v2463_v31 }
0x14ed   : > { %2283 = vmatpush3.bf16.msra.mxu1 %v2367_v40 }
0x15b3   : > { %v1723_v13 = vpop.f32.mrb[24].mxu1 }
0x15b4   : > { %v1724_v14 = vadd.f32 %v2093_v12, %v1723_v13  ;;  %v2266_v15 = vpop.f32.mrb[25].mxu1  ;;  %v2126_v12 = vld [vmem:[%s2930_s10 + $0x1] ss:$0 sm:$0xff] }
0x15b5   : > { %v1726_v16 = vpop.f32.mrb[26].mxu1 }
0x15b6   : > { %v1729_v17 = vadd.f32 %v1724_v14, %v2755_v10  ;;  %v2267_v18 = vpop.f32.mrb[27].mxu1  ;;  %v2363_v10 = vld [vmem:[%s2927_s7 + $0x18] sm:$0xff]  }
0x15b7   : > { %2271 = vmatpush3.bf16.msra.mxu0 %v2363_v10 }
0x15b8   : > { %v1732_v19 = vsel %vm546_vm2, %v1729_v17, 0.0 }
0x15b9   : > { %1733 = vadd.xlane.f32.xlu0 %v1732_v19 }
0x1646   : > { %v1734_v20 = vpop.xlane.xlu0 %1733 }
0x1647   : > { %v1735_v21 = vmul.f32 0.03125, %v1734_v20 }
0x1649   : > { %v1736_v22 = vsub.f32 %v1729_v17, %v1735_v21 }
0x164b   : > { %v1737_v24 = vmul.f32 %v1736_v22, %v1736_v22 }
0x164d   : > { %v1738_v25 = vsel %vm546_vm2, %v1737_v24, 0.0 }
0x164e   : > { %1739 = vadd.xlane.f32.xlu1 %v1738_v25 }
0x16db   : > { %v1740_v27 = vpop.xlane.xlu1 %1739 }
0x16dc   : > { %v1741_v28 = vmul.f32 0.03125, %v1740_v27 }
0x16de   : > { %v1742_v29 = vadd.f32 1e-12, %v1741_v28 }
0x16e0   : > { %2392 = vrsqrt.f32 %v1742_v29 }
0x16ea   : > { %v2393_v30 = vpop.eup %2392 }
0x16eb   : > { %v1744_v33 = vmul.f32 %v2393_v30, %v1736_v22 }
0x16ed   : > { %v1749_v35 = vmul.f32 %v2099_v32, %v1744_v33 }
0x16ef   : > { %v1754_v36 = vadd.f32 %v2100_v34, %v1749_v35 }
0x16f1   : > { %v1755_v37 = vpack.c.bf16 %v1754_v36, %v1754_v36 }
0x16f3   : > { %2273 = vmatmul.mubr.msk.bf16.vlgmr.msra.gmra.mrb[16].mxu0 %vm595_vm4, %v1755_v37 }
0x17c6   : > { %v1818_v42 = vpop.f32.mrb[16].mxu0 }
0x17c7   : > { %v1819_v43 = vadd.f32 %v2106_v41, %v1818_v42  ;;  %v2274_v44 = vpop.f32.mrb[17].mxu0 }
0x17c8   : > { %v1821_v45 = vpop.f32.mrb[18].mxu0 }
0x17c9   : > { %v1825_v46 = vmul.f32 0.044715, %v1819_v43  ;;  %v2275_v47 = vpop.f32.mrb[19].mxu0  ;;  %v1824_v53 = vmul.f32 0.5, %v1819_v43 }
0x17cb   : > { %v1826_v48 = vmul.f32 %v1825_v46, %v1819_v43 }
0x17cd   : > { %v1827_v49 = vmul.f32 %v1826_v48, %v1819_v43 }
0x17cf   : > { %v1828_v50 = vadd.f32 %v1827_v49, %v1819_v43 }
0x17d1   : > { %v1829_v51 = vmul.f32 0.7978846, %v1828_v50 }
0x17d3   : > { %2394 = vtanh.f32 %v1829_v51 }
0x17dd   : > { %v2395_v52 = vpop.eup %2394 }
0x17de   : > { %v1831_v54 = vadd.f32 1.0, %v2395_v52 }
0x17e0   : > { %v1832_v31 = vmul.f32 %v1831_v54, %v1824_v53 }
0x17e2   : > { %v1833_v55 = vpack.c.bf16 %v1832_v31, %v1832_v31 }
0x17e4   : > { %2285 = vmatmul.mubr.msk.bf16.vlgmr.msra.gmra.mrb[28].mxu1 %vm495_vm0, %v1833_v55 }
0x18b7   : > { %v1909_v57 = vpop.f32.mrb[28].mxu1 }
0x18b8   : > { %v1910_v58 = vadd.f32 %v2119_v56, %v1909_v57  ;;  %v2286_v59 = vpop.f32.mrb[29].mxu1 }
0x18b9   : > { %v1912_v60 = vpop.f32.mrb[30].mxu1 }
0x18ba   : > { %v2287_v61 = vpop.f32.mrb[31].mxu1  ;;  %v1915_v62 = vadd.f32 %v1910_v58, %v1729_v17 }
0x18bc   : > { %v1918_v63 = vsel %vm546_vm2, %v1915_v62, 0.0 }
0x18bd   : > { %1919 = vadd.xlane.f32.xlu0 %v1918_v63 }
0x194a   : > { %v1920_v0 = vpop.xlane.xlu0 %1919 }
0x194b   : > { %v1921_v1 = vmul.f32 0.03125, %v1920_v0 }
0x194d   : > { %v1922_v2 = vsub.f32 %v1915_v62, %v1921_v1 }
0x194f   : > { %v1923_v3 = vmul.f32 %v1922_v2, %v1922_v2 }
0x1951   : > { %v1924_v4 = vsel %vm546_vm2, %v1923_v3, 0.0 }
0x1952   : > { %1925 = vadd.xlane.f32.xlu0 %v1924_v4 }
0x19df   : > { %v1926_v5 = vpop.xlane.xlu0 %1925 }
0x19e0   : > { %v1927_v6 = vmul.f32 0.03125, %v1926_v5 }
0x19e2   : > { %v1928_v7 = vadd.f32 1e-12, %v1927_v6 }
0x19e4   : > { %2396 = vrsqrt.f32 %v1928_v7 }
0x19ee   : > { %v2397_v8 = vpop.eup %2396 }
0x19ef   : > { %v1930_v11 = vmul.f32 %v2397_v8, %v1922_v2 }
0x19f1   : > { %v1935_v13 = vmul.f32 %v2125_v9, %v1930_v11 }
0x19f3   : > { %v1940_v14 = vadd.f32 %v2126_v12, %v1935_v13 }
0x19f5   : > { %1942 = vst.msk [vmem:[%s379_s15 - $0x1] sm:$0x1e] %vm1941_vm9, %v1940_v14 }
0x19f6   : > { %2411 = shalt.err (!%p2408_p3)
}
0x19f7   : > { %s2412_s30 = scalar_lea.hbm %s2878_s0, 64  ;;  %s2416_s15 = scalar_lea.hbm %s2931_s11, 128 }
0x19f8   : > { %p2413_p4 = scmp.ne.s32.totalorder %s2878_s0, %s2412_s30  ;;  %p2417_p9 = scmp.lt.u32.totalorder %s2878_s0, %s2931_s11 }
0x19f9   : > { %p2418_p10 = scmp.lt.u32.totalorder %s2416_s15, %s2412_s30  ;;  %p2420_p12 = scmp.lt.u32.totalorder %s2412_s30, %s2878_s0 }
0x19fa   : > { %p2414_p7 = pnand %p2413_p4, %p2570_p5 }
0x19fb   : > { %p2419_p11 = por %p2418_p10, %p2417_p9 }
0x19fc   : > { %p2415_p8 = pneg %p2414_p7 }
0x19fd   : > { %p2421_p13 = por %p2420_p12, %p2419_p11 }
0x19ff   : > { %p2422_p0 = pnand %p2421_p13, %p2415_p8 }
0x1a01   : > { %2425 = shalt.err (!%p2422_p0)
}
0x1a02   : > { %2288 = dma.vmem_to_hbm [thread:$0]  (%p2570_p5), %s2880_s26, 64, %s2878_s0, %s1944_s22  }
0x1a03 PF: > { %p2294_p1 = scmp.ge.s32.totalorder %s2460_s20, 2  ;;  %s1969_s14 = sand.u32 1, %s2448_s17  }
0x1a04   : > { %s1970_s21 = scalar_lea.sflag [#allocation3], %s1969_s14 }
0x1a05   : > { %p2291_p2 = pnand %p2294_p1, %p2574_p6 }
0x1a07   : > { %2443 = dma.done.wait (!%p2291_p2), %s1970_s21, 64  }
0x1a08   : > { %2445 = vsyncadd (!%p2291_p2), %s1970_s21, 4294967232  ;;  %s2943_s13 = sld [smem:[#allocation5_spill]]  ;;  %p21_p3 = scmp.ge.s32.totalorder %s2557_s23, 4  }
0x1a09   : > { %s2944_s17 = smov %s2452_s18  ;;  %s2945_s18 = smov %s2456_s19 }
0x1a0a   : > { %s2947_s20 = smov %s2557_s23  ;;  %23 = sbr.rel (!%p21_p3) target bundleno = 5 (0x5), region = 106 }
0x1a0e   : > { %s2946_s19 = smov %s2943_s13 }
0x1a11   :  { %1975 = vsyncpa [#allocation3], 1 }
0x1a12   :  { %1977 = vsyncpa [#allocation3 + $0x1], 1 }

</bundles_post_ra>
